<compile_context>
chip_gen: v5e
topology: v5e:2x2
jax: 0.10.0
libtpu: 0.0.40
codegen_flags: <defaults>
</compile_context>

<pallas_src>
import jax
import jax.numpy as jnp
from jax import lax
from jax.experimental import pallas as pl
from jax.experimental.pallas import tpu as pltpu


# ----------------------------- Pallas kernel --------------------------------

def make_fused_lstm_kernel(num_layers, seq_len, batch, hidden):
    """Kernel: x_flat, layer-0 (Wih, Whh, b), [stacked (Wxh, b)]*, h0, c0,
    W_out, b_out  ->  pred (batch, out)."""
    H = hidden

    def kernel(*refs):
        xf_ref, wih0_ref, whh0_ref, b0_ref = refs[0:4]
        stack_refs = [(refs[4 + 2 * i], refs[5 + 2 * i])
                      for i in range(num_layers - 1)]
        base = 4 + 2 * (num_layers - 1)
        h0_ref = refs[base]
        c0_ref = refs[base + 1]
        wout_ref = refs[base + 2]
        bout_ref = refs[base + 3]
        out_ref = refs[base + 4]
        xproj_ref = refs[base + 5]          # VMEM scratch (seq*batch, 4H)

        # ------------------ hoisted, outside the recurrence -----------------
        # Layer-0 input projection for ALL timesteps in one lane-dense matmul
        # (bias folded in); result parked in VMEM scratch for per-step slicing.
        xproj_ref[...] = (jnp.dot(xf_ref[...], wih0_ref[...],
                                  preferred_element_type=jnp.float32)
                          + b0_ref[...])
        whh0 = whh0_ref[...]
        stacks = [(w_ref[...], b_ref[...]) for w_ref, b_ref in stack_refs]

        # Packed-gate activation constants (gate order i|f|g|o on lanes):
        #   sigmoid(x) = 0.5 * (1 + tanh(x/2)) for i/f/o lanes, tanh for g.
        lane = lax.broadcasted_iota(jnp.int32, (batch, 4 * H), 1)
        is_g = (lane >= 2 * H) & (lane < 3 * H)
        mul_v = jnp.where(is_g, 1.0, 0.5).astype(jnp.float32)  # pre & post scale
        add_v = jnp.where(is_g, 0.0, 0.5).astype(jnp.float32)  # post offset

        def cell_update(pre, c):
            # ONE EUP tanh covers all four gates of this cell.
            t = jnp.tanh(pre * mul_v)
            act = t * mul_v + add_v          # i/f/o -> sigmoid, g -> tanh
            i_g = act[:, 0:H]
            f_g = act[:, H:2 * H]
            g_g = act[:, 2 * H:3 * H]
            o_g = act[:, 3 * H:4 * H]
            c_new = f_g * c + i_g * g_g
            h_new = o_g * jnp.tanh(c_new)
            return h_new, c_new

        def body(t, carry):
            new_carry = list(carry)
            # Layer 0: only the recurrent h @ Whh dot remains in the loop.
            h, c = carry[0], carry[1]
            pre = (xproj_ref[pl.ds(t * batch, batch), :]
                   + jnp.dot(h, whh0, preferred_element_type=jnp.float32))
            h, c = cell_update(pre, c)
            new_carry[0], new_carry[1] = h, c
            inp = h
            # Layers 1..L-1: single fused [x_t, h] @ (2H, 4H) matmul per cell.
            for l in range(1, num_layers):
                w_stack, b_l = stacks[l - 1]
                hl, cl = carry[2 * l], carry[2 * l + 1]
                xh = jnp.concatenate([inp, hl], axis=-1)        # (batch, 2H)
                pre = (jnp.dot(xh, w_stack,
                               preferred_element_type=jnp.float32) + b_l)
                hl, cl = cell_update(pre, cl)
                new_carry[2 * l], new_carry[2 * l + 1] = hl, cl
                inp = hl
            return tuple(new_carry)

        init = ()
        for l in range(num_layers):
            init += (h0_ref[l], c0_ref[l])

        # Short fixed trip count -> fully unrolled in-kernel time loop.
        final = lax.fori_loop(0, seq_len, body, init, unroll=True)

        h_last = final[2 * (num_layers - 1)]                    # top layer, last t
        out_ref[...] = (jnp.dot(h_last, wout_ref[...],
                                preferred_element_type=jnp.float32)
                        + bout_ref[...]).astype(out_ref.dtype)

    return kernel


def lstm_forward(params, input_seq, state_key):
    """Matches LSTM.forward: random (h_0, c_0), stacked LSTM, Linear, last step."""
    batch, seq_len, input_size = input_seq.shape
    layers = params["layers"]
    num_layers = len(layers)
    hidden = params["hidden_size"]
    output_size = params["w_out_t"].shape[1]

    kh, kc = jax.random.split(state_key)
    # TODO(synk): torch.randn initial state is sampled here with jax.random
    # (different RNG stream than torch, same semantics). In-kernel
    # pltpu.prng_seed/stateful_normal would drop two tiny DMAs but make the
    # initial state unobservable for the host-side reference check.
    h0 = jax.random.normal(kh, (num_layers, batch, hidden), jnp.float32)
    c0 = jax.random.normal(kc, (num_layers, batch, hidden), jnp.float32)

    # (batch, seq, in) -> (seq*batch, in): layer 0's input projection becomes
    # one matmul inside the kernel, hoisted out of the recurrence.
    x_flat = jnp.transpose(input_seq, (1, 0, 2)).reshape(seq_len * batch,
                                                         input_size)

    args = [x_flat, layers[0]["w_ih"], layers[0]["w_hh"], layers[0]["b"]]
    for lp in layers[1:]:
        args += [lp["w_stack"], lp["b"]]
    args += [h0, c0, params["w_out_t"], params["b_out"]]

    vmem = pl.BlockSpec(memory_space=pltpu.MemorySpace.VMEM)
    return pl.pallas_call(
        make_fused_lstm_kernel(num_layers, seq_len, batch, hidden),
        out_shape=jax.ShapeDtypeStruct((batch, output_size), jnp.float32),
        in_specs=[vmem] * len(args),
        out_specs=vmem,
        scratch_shapes=[pltpu.VMEM((seq_len * batch, 4 * hidden), jnp.float32)],
    )(*args)


# ------------------------- parameters ---------------------------------------

def init_params(key, input_size, hidden_size, num_layers, output_size):
    """Deterministic init mirroring PyTorch's U(-1/sqrt(H), 1/sqrt(H)).

    Weights are repacked lane-dense: W_ih -> (in, 4H), W_hh -> (H, 4H) with
    the four gates (PyTorch order i|f|g|o) concatenated on the last axis, and
    for layers >= 1 a stacked (2H, 4H) weight for the fused [x, h] matmul.
    """
    bound = 1.0 / float(hidden_size) ** 0.5
    keys = jax.random.split(key, num_layers * 4 + 2)
    layers = []
    for l in range(num_layers):
        in_l = input_size if l == 0 else hidden_size
        k_wi, k_wh, k_bi, k_bh = keys[4 * l:4 * l + 4]
        w_ih = jax.random.uniform(k_wi, (4 * hidden_size, in_l),
                                  jnp.float32, -bound, bound)
        w_hh = jax.random.uniform(k_wh, (4 * hidden_size, hidden_size),
                                  jnp.float32, -bound, bound)
        b_ih = jax.random.uniform(k_bi, (4 * hidden_size,),
                                  jnp.float32, -bound, bound)
        b_hh = jax.random.uniform(k_bh, (4 * hidden_size,),
                                  jnp.float32, -bound, bound)
        w_ih_t = jnp.transpose(w_ih)                       # (in_l, 4H)
        w_hh_t = jnp.transpose(w_hh)                       # (H, 4H)
        entry = {
            "w_ih": w_ih_t,
            "w_hh": w_hh_t,
            "b": (b_ih + b_hh).reshape(1, 4 * hidden_size),   # (1, 4H)
        }
        if l > 0:
            entry["w_stack"] = jnp.concatenate([w_ih_t, w_hh_t], axis=0)  # (2H, 4H)
        layers.append(entry)
    k_wo, k_bo = keys[-2:]
    w_out = jax.random.uniform(k_wo, (output_size, hidden_size),
                               jnp.float32, -bound, bound)
    b_out = jax.random.uniform(k_bo, (output_size,), jnp.float32, -bound, bound)
    return {
        "hidden_size": hidden_size,
        "layers": layers,
        "w_out_t": jnp.transpose(w_out),                   # (H, out)
        "b_out": b_out.reshape(1, output_size),            # (1, out)
    }


# ----------------------------- pure-JAX reference ---------------------------

def _ref_layer(x_tm, w_ih, w_hh, b, h0, c0):
    H = h0.shape[-1]

    def step(carry, x_t):
        h, c = carry
        pre = x_t @ w_ih + h @ w_hh + b                    # (batch, 4H)
        i = jax.nn.sigmoid(pre[:, 0:H])
        f = jax.nn.sigmoid(pre[:, H:2 * H])
        g = jnp.tanh(pre[:, 2 * H:3 * H])
        o = jax.nn.sigmoid(pre[:, 3 * H:4 * H])
        c = f * c + i * g
        h = o * jnp.tanh(c)
        return (h, c), h

    _, hs = lax.scan(step, (h0, c0), x_tm)
    return hs


def ref_forward(params, input_seq, state_key):
    batch = input_seq.shape[0]
    num_layers = len(params["layers"])
    hidden = params["hidden_size"]
    kh, kc = jax.random.split(state_key)
    h0 = jax.random.normal(kh, (num_layers, batch, hidden), jnp.float32)
    c0 = jax.random.normal(kc, (num_layers, batch, hidden), jnp.float32)
    x_tm = jnp.transpose(input_seq, (1, 0, 2))
    for l, lp in enumerate(params["layers"]):
        x_tm = _ref_layer(x_tm, lp["w_ih"], lp["w_hh"], lp["b"], h0[l], c0[l])
    return x_tm[-1] @ params["w_out_t"] + params["b_out"]


# ----------------------------------- main ------------------------------------

if __name__ == "__main__":
    input_size, hidden_size, num_layers, output_size = 4, 32, 2, 4
    batch, seq_len = 2, 8

    key = jax.random.PRNGKey(0)
    k_param, k_x, k_state = jax.random.split(key, 3)

    params = init_params(k_param, input_size, hidden_size, num_layers,
                         output_size)
    input_seq = jax.random.normal(k_x, (batch, seq_len, input_size),
                                  jnp.float32)

    pred = jax.block_until_ready(lstm_forward(params, input_seq, k_state))
    assert pred.shape == (batch, output_size), pred.shape

    ref = jax.block_until_ready(ref_forward(params, input_seq, k_state))
    assert jnp.allclose(pred, ref, atol=1e-4, rtol=1e-4), \
        f"mismatch: max abs err {jnp.max(jnp.abs(pred - ref))}"

    print("KERNEL_OK")
</pallas_src>

<mosaic_0001>
module attributes {stable_mosaic.version = 11 : i64} {
  func.func @kernel(%arg0: memref<16x4xf32, #tpu.memory_space<vmem>>, %arg1: memref<4x128xf32, #tpu.memory_space<vmem>>, %arg2: memref<32x128xf32, #tpu.memory_space<vmem>>, %arg3: memref<1x128xf32, #tpu.memory_space<vmem>>, %arg4: memref<64x128xf32, #tpu.memory_space<vmem>>, %arg5: memref<1x128xf32, #tpu.memory_space<vmem>>, %arg6: memref<2x2x32xf32, #tpu.memory_space<vmem>>, %arg7: memref<2x2x32xf32, #tpu.memory_space<vmem>>, %arg8: memref<32x4xf32, #tpu.memory_space<vmem>>, %arg9: memref<1x4xf32, #tpu.memory_space<vmem>>, %arg10: memref<2x4xf32, #tpu.memory_space<vmem>>, %arg11: memref<16x128xf32, #tpu.memory_space<vmem>>) attributes {dimension_semantics = [], scalar_prefetch = 0 : i64, scratch_operands = 1 : i64, tpu.core_type = #tpu.core_type<tc>} {
    %c0 = arith.constant 0 : index
    %c0_0 = arith.constant 0 : index
    %0 = vector.load %arg0[%c0, %c0_0] : memref<16x4xf32, #tpu.memory_space<vmem>>, vector<16x4xf32>
    %c0_1 = arith.constant 0 : index
    %c0_2 = arith.constant 0 : index
    %1 = vector.load %arg1[%c0_1, %c0_2] : memref<4x128xf32, #tpu.memory_space<vmem>>, vector<4x128xf32>
    %cst = arith.constant dense<0.000000e+00> : vector<16x128xf32>
    %2 = tpu.matmul %0, %1, %cst {dimension_numbers = #tpu.dot_dimension_numbers<[1], [0], [0], [1], [0, 0, 1, 1], [], []>} : vector<16x4xf32>, vector<4x128xf32>, vector<16x128xf32> -> vector<16x128xf32>
    %c0_3 = arith.constant 0 : index
    %c0_4 = arith.constant 0 : index
    %3 = vector.load %arg3[%c0_3, %c0_4] : memref<1x128xf32, #tpu.memory_space<vmem>>, vector<1x128xf32>
    %4 = vector.broadcast %3 : vector<1x128xf32> to vector<16x128xf32>
    %5 = arith.addf %2, %4 : vector<16x128xf32>
    %c0_5 = arith.constant 0 : index
    %c0_6 = arith.constant 0 : index
    %6 = vector.load %arg11[%c0_5, %c0_6] : memref<16x128xf32, #tpu.memory_space<vmem>>, vector<16x128xf32>
    tpu.vector_store %arg11[%c0_5, %c0_6], %5 {strides = array<i32>} : memref<16x128xf32, #tpu.memory_space<vmem>>, vector<16x128xf32>,
    %c0_7 = arith.constant 0 : index
    %c0_8 = arith.constant 0 : index
    %7 = vector.load %arg2[%c0_7, %c0_8] : memref<32x128xf32, #tpu.memory_space<vmem>>, vector<32x128xf32>
    %c0_9 = arith.constant 0 : index
    %c0_10 = arith.constant 0 : index
    %8 = vector.load %arg4[%c0_9, %c0_10] : memref<64x128xf32, #tpu.memory_space<vmem>>, vector<64x128xf32>
    %c0_11 = arith.constant 0 : index
    %c0_12 = arith.constant 0 : index
    %9 = vector.load %arg5[%c0_11, %c0_12] : memref<1x128xf32, #tpu.memory_space<vmem>>, vector<1x128xf32>
    %10 = tpu.iota {dimensions = array<i32: 1>} : vector<2x128xi32>
    %c64_i32 = arith.constant 64 : i32
    %11 = vector.broadcast %c64_i32 : i32 to vector<2x128xi32>
    %12 = arith.cmpi sge, %10, %11 : vector<2x128xi32>
    %c96_i32 = arith.constant 96 : i32
    %13 = vector.broadcast %c96_i32 : i32 to vector<2x128xi32>
    %14 = arith.cmpi slt, %10, %13 : vector<2x128xi32>
    %15 = arith.andi %12, %14 : vector<2x128xi1>
    %cst_13 = arith.constant 1.000000e+00 : f32
    %cst_14 = arith.constant 5.000000e-01 : f32
    %16 = vector.broadcast %cst_13 : f32 to vector<2x128xf32>
    %17 = vector.broadcast %cst_14 : f32 to vector<2x128xf32>
    %18 = arith.select %15, %16, %17 : vector<2x128xi1>, vector<2x128xf32>
    %cst_15 = arith.constant 0.000000e+00 : f32
    %cst_16 = arith.constant 5.000000e-01 : f32
    %19 = vector.broadcast %cst_15 : f32 to vector<2x128xf32>
    %20 = vector.broadcast %cst_16 : f32 to vector<2x128xf32>
    %21 = arith.select %15, %19, %20 : vector<2x128xi1>, vector<2x128xf32>
    %c0_17 = arith.constant 0 : index
    %c0_18 = arith.constant 0 : index
    %c0_19 = arith.constant 0 : index
    %22 = vector.load %arg6[%c0_17, %c0_18, %c0_19] : memref<2x2x32xf32, #tpu.memory_space<vmem>>, vector<1x2x32xf32>
    %23 = vector.shape_cast %22 : vector<1x2x32xf32> to vector<2x32xf32>
    %c0_20 = arith.constant 0 : index
    %c0_21 = arith.constant 0 : index
    %c0_22 = arith.constant 0 : index
    %24 = vector.load %arg7[%c0_20, %c0_21, %c0_22] : memref<2x2x32xf32, #tpu.memory_space<vmem>>, vector<1x2x32xf32>
    %25 = vector.shape_cast %24 : vector<1x2x32xf32> to vector<2x32xf32>
    %c1 = arith.constant 1 : index
    %c0_23 = arith.constant 0 : index
    %c0_24 = arith.constant 0 : index
    %26 = vector.load %arg6[%c1, %c0_23, %c0_24] : memref<2x2x32xf32, #tpu.memory_space<vmem>>, vector<1x2x32xf32>
    %27 = vector.shape_cast %26 : vector<1x2x32xf32> to vector<2x32xf32>
    %c1_25 = arith.constant 1 : index
    %c0_26 = arith.constant 0 : index
    %c0_27 = arith.constant 0 : index
    %28 = vector.load %arg7[%c1_25, %c0_26, %c0_27] : memref<2x2x32xf32, #tpu.memory_space<vmem>>, vector<1x2x32xf32>
    %29 = vector.shape_cast %28 : vector<1x2x32xf32> to vector<2x32xf32>
    %c0_i32 = arith.constant 0 : i32
    %c2_i32 = arith.constant 2 : i32
    %30 = arith.muli %c0_i32, %c2_i32 : i32
    %31 = arith.index_cast %30 : i32 to index
    %c0_28 = arith.constant 0 : index
    %32 = vector.load %arg11[%31, %c0_28] : memref<16x128xf32, #tpu.memory_space<vmem>>, vector<2x128xf32>
    %cst_29 = arith.constant dense<0.000000e+00> : vector<2x128xf32>
    %33 = tpu.matmul %23, %7, %cst_29 {dimension_numbers = #tpu.dot_dimension_numbers<[1], [0], [0], [1], [0, 0, 1, 1], [], []>} : vector<2x32xf32>, vector<32x128xf32>, vector<2x128xf32> -> vector<2x128xf32>
    %34 = arith.addf %32, %33 : vector<2x128xf32>
    %35 = arith.mulf %34, %18 : vector<2x128xf32>
    %36 = math.tanh %35 : vector<2x128xf32>
    %37 = arith.mulf %36, %18 : vector<2x128xf32>
    %38 = arith.addf %37, %21 : vector<2x128xf32>
    %39 = vector.extract_strided_slice %38 {offsets = [0, 0], sizes = [2, 32], strides = [1, 1]} : vector<2x128xf32> to vector<2x32xf32>
    %40 = vector.extract_strided_slice %38 {offsets = [0, 32], sizes = [2, 32], strides = [1, 1]} : vector<2x128xf32> to vector<2x32xf32>
    %41 = vector.extract_strided_slice %38 {offsets = [0, 64], sizes = [2, 32], strides = [1, 1]} : vector<2x128xf32> to vector<2x32xf32>
    %42 = vector.extract_strided_slice %38 {offsets = [0, 96], sizes = [2, 32], strides = [1, 1]} : vector<2x128xf32> to vector<2x32xf32>
    %43 = arith.mulf %40, %25 : vector<2x32xf32>
    %44 = arith.mulf %39, %41 : vector<2x32xf32>
    %45 = arith.addf %43, %44 : vector<2x32xf32>
    %46 = math.tanh %45 : vector<2x32xf32>
    %47 = arith.mulf %42, %46 : vector<2x32xf32>
    %48 = tpu.concatenate %47, %27 in 1 : vector<2x32xf32>, vector<2x32xf32> -> vector<2x64xf32>
    %cst_30 = arith.constant dense<0.000000e+00> : vector<2x128xf32>
    %49 = tpu.matmul %48, %8, %cst_30 {dimension_numbers = #tpu.dot_dimension_numbers<[1], [0], [0], [1], [0, 0, 1, 1], [], []>} : vector<2x64xf32>, vector<64x128xf32>, vector<2x128xf32> -> vector<2x128xf32>
    %50 = vector.broadcast %9 : vector<1x128xf32> to vector<2x128xf32>
    %51 = arith.addf %49, %50 : vector<2x128xf32>
    %52 = arith.mulf %51, %18 : vector<2x128xf32>
    %53 = math.tanh %52 : vector<2x128xf32>
    %54 = arith.mulf %53, %18 : vector<2x128xf32>
    %55 = arith.addf %54, %21 : vector<2x128xf32>
    %56 = vector.extract_strided_slice %55 {offsets = [0, 0], sizes = [2, 32], strides = [1, 1]} : vector<2x128xf32> to vector<2x32xf32>
    %57 = vector.extract_strided_slice %55 {offsets = [0, 32], sizes = [2, 32], strides = [1, 1]} : vector<2x128xf32> to vector<2x32xf32>
    %58 = vector.extract_strided_slice %55 {offsets = [0, 64], sizes = [2, 32], strides = [1, 1]} : vector<2x128xf32> to vector<2x32xf32>
    %59 = vector.extract_strided_slice %55 {offsets = [0, 96], sizes = [2, 32], strides = [1, 1]} : vector<2x128xf32> to vector<2x32xf32>
    %60 = arith.mulf %57, %29 : vector<2x32xf32>
    %61 = arith.mulf %56, %58 : vector<2x32xf32>
    %62 = arith.addf %60, %61 : vector<2x32xf32>
    %63 = math.tanh %62 : vector<2x32xf32>
    %64 = arith.mulf %59, %63 : vector<2x32xf32>
    %c1_i32 = arith.constant 1 : i32
    %c2_i32_31 = arith.constant 2 : i32
    %65 = arith.muli %c1_i32, %c2_i32_31 : i32
    %66 = arith.index_cast %65 : i32 to index
    %c0_32 = arith.constant 0 : index
    %67 = vector.load %arg11[%66, %c0_32] : memref<16x128xf32, #tpu.memory_space<vmem>>, vector<2x128xf32>
    %cst_33 = arith.constant dense<0.000000e+00> : vector<2x128xf32>
    %68 = tpu.matmul %47, %7, %cst_33 {dimension_numbers = #tpu.dot_dimension_numbers<[1], [0], [0], [1], [0, 0, 1, 1], [], []>} : vector<2x32xf32>, vector<32x128xf32>, vector<2x128xf32> -> vector<2x128xf32>
    %69 = arith.addf %67, %68 : vector<2x128xf32>
    %70 = arith.mulf %69, %18 : vector<2x128xf32>
    %71 = math.tanh %70 : vector<2x128xf32>
    %72 = arith.mulf %71, %18 : vector<2x128xf32>
    %73 = arith.addf %72, %21 : vector<2x128xf32>
    %74 = vector.extract_strided_slice %73 {offsets = [0, 0], sizes = [2, 32], strides = [1, 1]} : vector<2x128xf32> to vector<2x32xf32>
    %75 = vector.extract_strided_slice %73 {offsets = [0, 32], sizes = [2, 32], strides = [1, 1]} : vector<2x128xf32> to vector<2x32xf32>
    %76 = vector.extract_strided_slice %73 {offsets = [0, 64], sizes = [2, 32], strides = [1, 1]} : vector<2x128xf32> to vector<2x32xf32>
    %77 = vector.extract_strided_slice %73 {offsets = [0, 96], sizes = [2, 32], strides = [1, 1]} : vector<2x128xf32> to vector<2x32xf32>
    %78 = arith.mulf %75, %45 : vector<2x32xf32>
    %79 = arith.mulf %74, %76 : vector<2x32xf32>
    %80 = arith.addf %78, %79 : vector<2x32xf32>
    %81 = math.tanh %80 : vector<2x32xf32>
    %82 = arith.mulf %77, %81 : vector<2x32xf32>
    %83 = tpu.concatenate %82, %64 in 1 : vector<2x32xf32>, vector<2x32xf32> -> vector<2x64xf32>
    %cst_34 = arith.constant dense<0.000000e+00> : vector<2x128xf32>
    %84 = tpu.matmul %83, %8, %cst_34 {dimension_numbers = #tpu.dot_dimension_numbers<[1], [0], [0], [1], [0, 0, 1, 1], [], []>} : vector<2x64xf32>, vector<64x128xf32>, vector<2x128xf32> -> vector<2x128xf32>
    %85 = vector.broadcast %9 : vector<1x128xf32> to vector<2x128xf32>
    %86 = arith.addf %84, %85 : vector<2x128xf32>
    %87 = arith.mulf %86, %18 : vector<2x128xf32>
    %88 = math.tanh %87 : vector<2x128xf32>
    %89 = arith.mulf %88, %18 : vector<2x128xf32>
    %90 = arith.addf %89, %21 : vector<2x128xf32>
    %91 = vector.extract_strided_slice %90 {offsets = [0, 0], sizes = [2, 32], strides = [1, 1]} : vector<2x128xf32> to vector<2x32xf32>
    %92 = vector.extract_strided_slice %90 {offsets = [0, 32], sizes = [2, 32], strides = [1, 1]} : vector<2x128xf32> to vector<2x32xf32>
    %93 = vector.extract_strided_slice %90 {offsets = [0, 64], sizes = [2, 32], strides = [1, 1]} : vector<2x128xf32> to vector<2x32xf32>
    %94 = vector.extract_strided_slice %90 {offsets = [0, 96], sizes = [2, 32], strides = [1, 1]} : vector<2x128xf32> to vector<2x32xf32>
    %95 = arith.mulf %92, %62 : vector<2x32xf32>
    %96 = arith.mulf %91, %93 : vector<2x32xf32>
    %97 = arith.addf %95, %96 : vector<2x32xf32>
    %98 = math.tanh %97 : vector<2x32xf32>
    %99 = arith.mulf %94, %98 : vector<2x32xf32>
    %c2_i32_35 = arith.constant 2 : i32
    %c2_i32_36 = arith.constant 2 : i32
    %100 = arith.muli %c2_i32_35, %c2_i32_36 : i32
    %101 = arith.index_cast %100 : i32 to index
    %c0_37 = arith.constant 0 : index
    %102 = vector.load %arg11[%101, %c0_37] : memref<16x128xf32, #tpu.memory_space<vmem>>, vector<2x128xf32>
    %cst_38 = arith.constant dense<0.000000e+00> : vector<2x128xf32>
    %103 = tpu.matmul %82, %7, %cst_38 {dimension_numbers = #tpu.dot_dimension_numbers<[1], [0], [0], [1], [0, 0, 1, 1], [], []>} : vector<2x32xf32>, vector<32x128xf32>, vector<2x128xf32> -> vector<2x128xf32>
    %104 = arith.addf %102, %103 : vector<2x128xf32>
    %105 = arith.mulf %104, %18 : vector<2x128xf32>
    %106 = math.tanh %105 : vector<2x128xf32>
    %107 = arith.mulf %106, %18 : vector<2x128xf32>
    %108 = arith.addf %107, %21 : vector<2x128xf32>
    %109 = vector.extract_strided_slice %108 {offsets = [0, 0], sizes = [2, 32], strides = [1, 1]} : vector<2x128xf32> to vector<2x32xf32>
    %110 = vector.extract_strided_slice %108 {offsets = [0, 32], sizes = [2, 32], strides = [1, 1]} : vector<2x128xf32> to vector<2x32xf32>
    %111 = vector.extract_strided_slice %108 {offsets = [0, 64], sizes = [2, 32], strides = [1, 1]} : vector<2x128xf32> to vector<2x32xf32>
    %112 = vector.extract_strided_slice %108 {offsets = [0, 96], sizes = [2, 32], strides = [1, 1]} : vector<2x128xf32> to vector<2x32xf32>
    %113 = arith.mulf %110, %80 : vector<2x32xf32>
    %114 = arith.mulf %109, %111 : vector<2x32xf32>
    %115 = arith.addf %113, %114 : vector<2x32xf32>
    %116 = math.tanh %115 : vector<2x32xf32>
    %117 = arith.mulf %112, %116 : vector<2x32xf32>
    %118 = tpu.concatenate %117, %99 in 1 : vector<2x32xf32>, vector<2x32xf32> -> vector<2x64xf32>
    %cst_39 = arith.constant dense<0.000000e+00> : vector<2x128xf32>
    %119 = tpu.matmul %118, %8, %cst_39 {dimension_numbers = #tpu.dot_dimension_numbers<[1], [0], [0], [1], [0, 0, 1, 1], [], []>} : vector<2x64xf32>, vector<64x128xf32>, vector<2x128xf32> -> vector<2x128xf32>
    %120 = vector.broadcast %9 : vector<1x128xf32> to vector<2x128xf32>
    %121 = arith.addf %119, %120 : vector<2x128xf32>
    %122 = arith.mulf %121, %18 : vector<2x128xf32>
    %123 = math.tanh %122 : vector<2x128xf32>
    %124 = arith.mulf %123, %18 : vector<2x128xf32>
    %125 = arith.addf %124, %21 : vector<2x128xf32>
    %126 = vector.extract_strided_slice %125 {offsets = [0, 0], sizes = [2, 32], strides = [1, 1]} : vector<2x128xf32> to vector<2x32xf32>
    %127 = vector.extract_strided_slice %125 {offsets = [0, 32], sizes = [2, 32], strides = [1, 1]} : vector<2x128xf32> to vector<2x32xf32>
    %128 = vector.extract_strided_slice %125 {offsets = [0, 64], sizes = [2, 32], strides = [1, 1]} : vector<2x128xf32> to vector<2x32xf32>
    %129 = vector.extract_strided_slice %125 {offsets = [0, 96], sizes = [2, 32], strides = [1, 1]} : vector<2x128xf32> to vector<2x32xf32>
    %130 = arith.mulf %127, %97 : vector<2x32xf32>
    %131 = arith.mulf %126, %128 : vector<2x32xf32>
    %132 = arith.addf %130, %131 : vector<2x32xf32>
    %133 = math.tanh %132 : vector<2x32xf32>
    %134 = arith.mulf %129, %133 : vector<2x32xf32>
    %c3_i32 = arith.constant 3 : i32
    %c2_i32_40 = arith.constant 2 : i32
    %135 = arith.muli %c3_i32, %c2_i32_40 : i32
    %136 = arith.index_cast %135 : i32 to index
    %c0_41 = arith.constant 0 : index
    %137 = vector.load %arg11[%136, %c0_41] : memref<16x128xf32, #tpu.memory_space<vmem>>, vector<2x128xf32>
    %cst_42 = arith.constant dense<0.000000e+00> : vector<2x128xf32>
    %138 = tpu.matmul %117, %7, %cst_42 {dimension_numbers = #tpu.dot_dimension_numbers<[1], [0], [0], [1], [0, 0, 1, 1], [], []>} : vector<2x32xf32>, vector<32x128xf32>, vector<2x128xf32> -> vector<2x128xf32>
    %139 = arith.addf %137, %138 : vector<2x128xf32>
    %140 = arith.mulf %139, %18 : vector<2x128xf32>
    %141 = math.tanh %140 : vector<2x128xf32>
    %142 = arith.mulf %141, %18 : vector<2x128xf32>
    %143 = arith.addf %142, %21 : vector<2x128xf32>
    %144 = vector.extract_strided_slice %143 {offsets = [0, 0], sizes = [2, 32], strides = [1, 1]} : vector<2x128xf32> to vector<2x32xf32>
    %145 = vector.extract_strided_slice %143 {offsets = [0, 32], sizes = [2, 32], strides = [1, 1]} : vector<2x128xf32> to vector<2x32xf32>
    %146 = vector.extract_strided_slice %143 {offsets = [0, 64], sizes = [2, 32], strides = [1, 1]} : vector<2x128xf32> to vector<2x32xf32>
    %147 = vector.extract_strided_slice %143 {offsets = [0, 96], sizes = [2, 32], strides = [1, 1]} : vector<2x128xf32> to vector<2x32xf32>
    %148 = arith.mulf %145, %115 : vector<2x32xf32>
    %149 = arith.mulf %144, %146 : vector<2x32xf32>
    %150 = arith.addf %148, %149 : vector<2x32xf32>
    %151 = math.tanh %150 : vector<2x32xf32>
    %152 = arith.mulf %147, %151 : vector<2x32xf32>
    %153 = tpu.concatenate %152, %134 in 1 : vector<2x32xf32>, vector<2x32xf32> -> vector<2x64xf32>
    %cst_43 = arith.constant dense<0.000000e+00> : vector<2x128xf32>
    %154 = tpu.matmul %153, %8, %cst_43 {dimension_numbers = #tpu.dot_dimension_numbers<[1], [0], [0], [1], [0, 0, 1, 1], [], []>} : vector<2x64xf32>, vector<64x128xf32>, vector<2x128xf32> -> vector<2x128xf32>
    %155 = vector.broadcast %9 : vector<1x128xf32> to vector<2x128xf32>
    %156 = arith.addf %154, %155 : vector<2x128xf32>
    %157 = arith.mulf %156, %18 : vector<2x128xf32>
    %158 = math.tanh %157 : vector<2x128xf32>
    %159 = arith.mulf %158, %18 : vector<2x128xf32>
    %160 = arith.addf %159, %21 : vector<2x128xf32>
    %161 = vector.extract_strided_slice %160 {offsets = [0, 0], sizes = [2, 32], strides = [1, 1]} : vector<2x128xf32> to vector<2x32xf32>
    %162 = vector.extract_strided_slice %160 {offsets = [0, 32], sizes = [2, 32], strides = [1, 1]} : vector<2x128xf32> to vector<2x32xf32>
    %163 = vector.extract_strided_slice %160 {offsets = [0, 64], sizes = [2, 32], strides = [1, 1]} : vector<2x128xf32> to vector<2x32xf32>
    %164 = vector.extract_strided_slice %160 {offsets = [0, 96], sizes = [2, 32], strides = [1, 1]} : vector<2x128xf32> to vector<2x32xf32>
    %165 = arith.mulf %162, %132 : vector<2x32xf32>
    %166 = arith.mulf %161, %163 : vector<2x32xf32>
    %167 = arith.addf %165, %166 : vector<2x32xf32>
    %168 = math.tanh %167 : vector<2x32xf32>
    %169 = arith.mulf %164, %168 : vector<2x32xf32>
    %c4_i32 = arith.constant 4 : i32
    %c2_i32_44 = arith.constant 2 : i32
    %170 = arith.muli %c4_i32, %c2_i32_44 : i32
    %171 = arith.index_cast %170 : i32 to index
    %c0_45 = arith.constant 0 : index
    %172 = vector.load %arg11[%171, %c0_45] : memref<16x128xf32, #tpu.memory_space<vmem>>, vector<2x128xf32>
    %cst_46 = arith.constant dense<0.000000e+00> : vector<2x128xf32>
    %173 = tpu.matmul %152, %7, %cst_46 {dimension_numbers = #tpu.dot_dimension_numbers<[1], [0], [0], [1], [0, 0, 1, 1], [], []>} : vector<2x32xf32>, vector<32x128xf32>, vector<2x128xf32> -> vector<2x128xf32>
    %174 = arith.addf %172, %173 : vector<2x128xf32>
    %175 = arith.mulf %174, %18 : vector<2x128xf32>
    %176 = math.tanh %175 : vector<2x128xf32>
    %177 = arith.mulf %176, %18 : vector<2x128xf32>
    %178 = arith.addf %177, %21 : vector<2x128xf32>
    %179 = vector.extract_strided_slice %178 {offsets = [0, 0], sizes = [2, 32], strides = [1, 1]} : vector<2x128xf32> to vector<2x32xf32>
    %180 = vector.extract_strided_slice %178 {offsets = [0, 32], sizes = [2, 32], strides = [1, 1]} : vector<2x128xf32> to vector<2x32xf32>
    %181 = vector.extract_strided_slice %178 {offsets = [0, 64], sizes = [2, 32], strides = [1, 1]} : vector<2x128xf32> to vector<2x32xf32>
    %182 = vector.extract_strided_slice %178 {offsets = [0, 96], sizes = [2, 32], strides = [1, 1]} : vector<2x128xf32> to vector<2x32xf32>
    %183 = arith.mulf %180, %150 : vector<2x32xf32>
    %184 = arith.mulf %179, %181 : vector<2x32xf32>
    %185 = arith.addf %183, %184 : vector<2x32xf32>
    %186 = math.tanh %185 : vector<2x32xf32>
    %187 = arith.mulf %182, %186 : vector<2x32xf32>
    %188 = tpu.concatenate %187, %169 in 1 : vector<2x32xf32>, vector<2x32xf32> -> vector<2x64xf32>
    %cst_47 = arith.constant dense<0.000000e+00> : vector<2x128xf32>
    %189 = tpu.matmul %188, %8, %cst_47 {dimension_numbers = #tpu.dot_dimension_numbers<[1], [0], [0], [1], [0, 0, 1, 1], [], []>} : vector<2x64xf32>, vector<64x128xf32>, vector<2x128xf32> -> vector<2x128xf32>
    %190 = vector.broadcast %9 : vector<1x128xf32> to vector<2x128xf32>
    %191 = arith.addf %189, %190 : vector<2x128xf32>
    %192 = arith.mulf %191, %18 : vector<2x128xf32>
    %193 = math.tanh %192 : vector<2x128xf32>
    %194 = arith.mulf %193, %18 : vector<2x128xf32>
    %195 = arith.addf %194, %21 : vector<2x128xf32>
    %196 = vector.extract_strided_slice %195 {offsets = [0, 0], sizes = [2, 32], strides = [1, 1]} : vector<2x128xf32> to vector<2x32xf32>
    %197 = vector.extract_strided_slice %195 {offsets = [0, 32], sizes = [2, 32], strides = [1, 1]} : vector<2x128xf32> to vector<2x32xf32>
    %198 = vector.extract_strided_slice %195 {offsets = [0, 64], sizes = [2, 32], strides = [1, 1]} : vector<2x128xf32> to vector<2x32xf32>
    %199 = vector.extract_strided_slice %195 {offsets = [0, 96], sizes = [2, 32], strides = [1, 1]} : vector<2x128xf32> to vector<2x32xf32>
    %200 = arith.mulf %197, %167 : vector<2x32xf32>
    %201 = arith.mulf %196, %198 : vector<2x32xf32>
    %202 = arith.addf %200, %201 : vector<2x32xf32>
    %203 = math.tanh %202 : vector<2x32xf32>
    %204 = arith.mulf %199, %203 : vector<2x32xf32>
    %c5_i32 = arith.constant 5 : i32
    %c2_i32_48 = arith.constant 2 : i32
    %205 = arith.muli %c5_i32, %c2_i32_48 : i32
    %206 = arith.index_cast %205 : i32 to index
    %c0_49 = arith.constant 0 : index
    %207 = vector.load %arg11[%206, %c0_49] : memref<16x128xf32, #tpu.memory_space<vmem>>, vector<2x128xf32>
    %cst_50 = arith.constant dense<0.000000e+00> : vector<2x128xf32>
    %208 = tpu.matmul %187, %7, %cst_50 {dimension_numbers = #tpu.dot_dimension_numbers<[1], [0], [0], [1], [0, 0, 1, 1], [], []>} : vector<2x32xf32>, vector<32x128xf32>, vector<2x128xf32> -> vector<2x128xf32>
    %209 = arith.addf %207, %208 : vector<2x128xf32>
    %210 = arith.mulf %209, %18 : vector<2x128xf32>
    %211 = math.tanh %210 : vector<2x128xf32>
    %212 = arith.mulf %211, %18 : vector<2x128xf32>
    %213 = arith.addf %212, %21 : vector<2x128xf32>
    %214 = vector.extract_strided_slice %213 {offsets = [0, 0], sizes = [2, 32], strides = [1, 1]} : vector<2x128xf32> to vector<2x32xf32>
    %215 = vector.extract_strided_slice %213 {offsets = [0, 32], sizes = [2, 32], strides = [1, 1]} : vector<2x128xf32> to vector<2x32xf32>
    %216 = vector.extract_strided_slice %213 {offsets = [0, 64], sizes = [2, 32], strides = [1, 1]} : vector<2x128xf32> to vector<2x32xf32>
    %217 = vector.extract_strided_slice %213 {offsets = [0, 96], sizes = [2, 32], strides = [1, 1]} : vector<2x128xf32> to vector<2x32xf32>
    %218 = arith.mulf %215, %185 : vector<2x32xf32>
    %219 = arith.mulf %214, %216 : vector<2x32xf32>
    %220 = arith.addf %218, %219 : vector<2x32xf32>
    %221 = math.tanh %220 : vector<2x32xf32>
    %222 = arith.mulf %217, %221 : vector<2x32xf32>
    %223 = tpu.concatenate %222, %204 in 1 : vector<2x32xf32>, vector<2x32xf32> -> vector<2x64xf32>
    %cst_51 = arith.constant dense<0.000000e+00> : vector<2x128xf32>
    %224 = tpu.matmul %223, %8, %cst_51 {dimension_numbers = #tpu.dot_dimension_numbers<[1], [0], [0], [1], [0, 0, 1, 1], [], []>} : vector<2x64xf32>, vector<64x128xf32>, vector<2x128xf32> -> vector<2x128xf32>
    %225 = vector.broadcast %9 : vector<1x128xf32> to vector<2x128xf32>
    %226 = arith.addf %224, %225 : vector<2x128xf32>
    %227 = arith.mulf %226, %18 : vector<2x128xf32>
    %228 = math.tanh %227 : vector<2x128xf32>
    %229 = arith.mulf %228, %18 : vector<2x128xf32>
    %230 = arith.addf %229, %21 : vector<2x128xf32>
    %231 = vector.extract_strided_slice %230 {offsets = [0, 0], sizes = [2, 32], strides = [1, 1]} : vector<2x128xf32> to vector<2x32xf32>
    %232 = vector.extract_strided_slice %230 {offsets = [0, 32], sizes = [2, 32], strides = [1, 1]} : vector<2x128xf32> to vector<2x32xf32>
    %233 = vector.extract_strided_slice %230 {offsets = [0, 64], sizes = [2, 32], strides = [1, 1]} : vector<2x128xf32> to vector<2x32xf32>
    %234 = vector.extract_strided_slice %230 {offsets = [0, 96], sizes = [2, 32], strides = [1, 1]} : vector<2x128xf32> to vector<2x32xf32>
    %235 = arith.mulf %232, %202 : vector<2x32xf32>
    %236 = arith.mulf %231, %233 : vector<2x32xf32>
    %237 = arith.addf %235, %236 : vector<2x32xf32>
    %238 = math.tanh %237 : vector<2x32xf32>
    %239 = arith.mulf %234, %238 : vector<2x32xf32>
    %c6_i32 = arith.constant 6 : i32
    %c2_i32_52 = arith.constant 2 : i32
    %240 = arith.muli %c6_i32, %c2_i32_52 : i32
    %241 = arith.index_cast %240 : i32 to index
    %c0_53 = arith.constant 0 : index
    %242 = vector.load %arg11[%241, %c0_53] : memref<16x128xf32, #tpu.memory_space<vmem>>, vector<2x128xf32>
    %cst_54 = arith.constant dense<0.000000e+00> : vector<2x128xf32>
    %243 = tpu.matmul %222, %7, %cst_54 {dimension_numbers = #tpu.dot_dimension_numbers<[1], [0], [0], [1], [0, 0, 1, 1], [], []>} : vector<2x32xf32>, vector<32x128xf32>, vector<2x128xf32> -> vector<2x128xf32>
    %244 = arith.addf %242, %243 : vector<2x128xf32>
    %245 = arith.mulf %244, %18 : vector<2x128xf32>
    %246 = math.tanh %245 : vector<2x128xf32>
    %247 = arith.mulf %246, %18 : vector<2x128xf32>
    %248 = arith.addf %247, %21 : vector<2x128xf32>
    %249 = vector.extract_strided_slice %248 {offsets = [0, 0], sizes = [2, 32], strides = [1, 1]} : vector<2x128xf32> to vector<2x32xf32>
    %250 = vector.extract_strided_slice %248 {offsets = [0, 32], sizes = [2, 32], strides = [1, 1]} : vector<2x128xf32> to vector<2x32xf32>
    %251 = vector.extract_strided_slice %248 {offsets = [0, 64], sizes = [2, 32], strides = [1, 1]} : vector<2x128xf32> to vector<2x32xf32>
    %252 = vector.extract_strided_slice %248 {offsets = [0, 96], sizes = [2, 32], strides = [1, 1]} : vector<2x128xf32> to vector<2x32xf32>
    %253 = arith.mulf %250, %220 : vector<2x32xf32>
    %254 = arith.mulf %249, %251 : vector<2x32xf32>
    %255 = arith.addf %253, %254 : vector<2x32xf32>
    %256 = math.tanh %255 : vector<2x32xf32>
    %257 = arith.mulf %252, %256 : vector<2x32xf32>
    %258 = tpu.concatenate %257, %239 in 1 : vector<2x32xf32>, vector<2x32xf32> -> vector<2x64xf32>
    %cst_55 = arith.constant dense<0.000000e+00> : vector<2x128xf32>
    %259 = tpu.matmul %258, %8, %cst_55 {dimension_numbers = #tpu.dot_dimension_numbers<[1], [0], [0], [1], [0, 0, 1, 1], [], []>} : vector<2x64xf32>, vector<64x128xf32>, vector<2x128xf32> -> vector<2x128xf32>
    %260 = vector.broadcast %9 : vector<1x128xf32> to vector<2x128xf32>
    %261 = arith.addf %259, %260 : vector<2x128xf32>
    %262 = arith.mulf %261, %18 : vector<2x128xf32>
    %263 = math.tanh %262 : vector<2x128xf32>
    %264 = arith.mulf %263, %18 : vector<2x128xf32>
    %265 = arith.addf %264, %21 : vector<2x128xf32>
    %266 = vector.extract_strided_slice %265 {offsets = [0, 0], sizes = [2, 32], strides = [1, 1]} : vector<2x128xf32> to vector<2x32xf32>
    %267 = vector.extract_strided_slice %265 {offsets = [0, 32], sizes = [2, 32], strides = [1, 1]} : vector<2x128xf32> to vector<2x32xf32>
    %268 = vector.extract_strided_slice %265 {offsets = [0, 64], sizes = [2, 32], strides = [1, 1]} : vector<2x128xf32> to vector<2x32xf32>
    %269 = vector.extract_strided_slice %265 {offsets = [0, 96], sizes = [2, 32], strides = [1, 1]} : vector<2x128xf32> to vector<2x32xf32>
    %270 = arith.mulf %267, %237 : vector<2x32xf32>
    %271 = arith.mulf %266, %268 : vector<2x32xf32>
    %272 = arith.addf %270, %271 : vector<2x32xf32>
    %273 = math.tanh %272 : vector<2x32xf32>
    %274 = arith.mulf %269, %273 : vector<2x32xf32>
    %c7_i32 = arith.constant 7 : i32
    %c2_i32_56 = arith.constant 2 : i32
    %275 = arith.muli %c7_i32, %c2_i32_56 : i32
    %276 = arith.index_cast %275 : i32 to index
    %c0_57 = arith.constant 0 : index
    %277 = vector.load %arg11[%276, %c0_57] : memref<16x128xf32, #tpu.memory_space<vmem>>, vector<2x128xf32>
    %cst_58 = arith.constant dense<0.000000e+00> : vector<2x128xf32>
    %278 = tpu.matmul %257, %7, %cst_58 {dimension_numbers = #tpu.dot_dimension_numbers<[1], [0], [0], [1], [0, 0, 1, 1], [], []>} : vector<2x32xf32>, vector<32x128xf32>, vector<2x128xf32> -> vector<2x128xf32>
    %279 = arith.addf %277, %278 : vector<2x128xf32>
    %280 = arith.mulf %279, %18 : vector<2x128xf32>
    %281 = math.tanh %280 : vector<2x128xf32>
    %282 = arith.mulf %281, %18 : vector<2x128xf32>
    %283 = arith.addf %282, %21 : vector<2x128xf32>
    %284 = vector.extract_strided_slice %283 {offsets = [0, 0], sizes = [2, 32], strides = [1, 1]} : vector<2x128xf32> to vector<2x32xf32>
    %285 = vector.extract_strided_slice %283 {offsets = [0, 32], sizes = [2, 32], strides = [1, 1]} : vector<2x128xf32> to vector<2x32xf32>
    %286 = vector.extract_strided_slice %283 {offsets = [0, 64], sizes = [2, 32], strides = [1, 1]} : vector<2x128xf32> to vector<2x32xf32>
    %287 = vector.extract_strided_slice %283 {offsets = [0, 96], sizes = [2, 32], strides = [1, 1]} : vector<2x128xf32> to vector<2x32xf32>
    %288 = arith.mulf %285, %255 : vector<2x32xf32>
    %289 = arith.mulf %284, %286 : vector<2x32xf32>
    %290 = arith.addf %288, %289 : vector<2x32xf32>
    %291 = math.tanh %290 : vector<2x32xf32>
    %292 = arith.mulf %287, %291 : vector<2x32xf32>
    %293 = tpu.concatenate %292, %274 in 1 : vector<2x32xf32>, vector<2x32xf32> -> vector<2x64xf32>
    %cst_59 = arith.constant dense<0.000000e+00> : vector<2x128xf32>
    %294 = tpu.matmul %293, %8, %cst_59 {dimension_numbers = #tpu.dot_dimension_numbers<[1], [0], [0], [1], [0, 0, 1, 1], [], []>} : vector<2x64xf32>, vector<64x128xf32>, vector<2x128xf32> -> vector<2x128xf32>
    %295 = vector.broadcast %9 : vector<1x128xf32> to vector<2x128xf32>
    %296 = arith.addf %294, %295 : vector<2x128xf32>
    %297 = arith.mulf %296, %18 : vector<2x128xf32>
    %298 = math.tanh %297 : vector<2x128xf32>
    %299 = arith.mulf %298, %18 : vector<2x128xf32>
    %300 = arith.addf %299, %21 : vector<2x128xf32>
    %301 = vector.extract_strided_slice %300 {offsets = [0, 0], sizes = [2, 32], strides = [1, 1]} : vector<2x128xf32> to vector<2x32xf32>
    %302 = vector.extract_strided_slice %300 {offsets = [0, 32], sizes = [2, 32], strides = [1, 1]} : vector<2x128xf32> to vector<2x32xf32>
    %303 = vector.extract_strided_slice %300 {offsets = [0, 64], sizes = [2, 32], strides = [1, 1]} : vector<2x128xf32> to vector<2x32xf32>
    %304 = vector.extract_strided_slice %300 {offsets = [0, 96], sizes = [2, 32], strides = [1, 1]} : vector<2x128xf32> to vector<2x32xf32>
    %305 = arith.mulf %302, %272 : vector<2x32xf32>
    %306 = arith.mulf %301, %303 : vector<2x32xf32>
    %307 = arith.addf %305, %306 : vector<2x32xf32>
    %308 = math.tanh %307 : vector<2x32xf32>
    %309 = arith.mulf %304, %308 : vector<2x32xf32>
    %c8_i32 = arith.constant 8 : i32
    %c0_60 = arith.constant 0 : index
    %c0_61 = arith.constant 0 : index
    %310 = vector.load %arg8[%c0_60, %c0_61] : memref<32x4xf32, #tpu.memory_space<vmem>>, vector<32x4xf32>
    %cst_62 = arith.constant dense<0.000000e+00> : vector<2x4xf32>
    %311 = tpu.matmul %309, %310, %cst_62 {dimension_numbers = #tpu.dot_dimension_numbers<[1], [0], [0], [1], [0, 0, 1, 1], [], []>} : vector<2x32xf32>, vector<32x4xf32>, vector<2x4xf32> -> vector<2x4xf32>
    %c0_63 = arith.constant 0 : index
    %c0_64 = arith.constant 0 : index
    %312 = vector.load %arg9[%c0_63, %c0_64] : memref<1x4xf32, #tpu.memory_space<vmem>>, vector<1x4xf32>
    %313 = vector.broadcast %312 : vector<1x4xf32> to vector<2x4xf32>
    %314 = arith.addf %311, %313 : vector<2x4xf32>
    %c0_65 = arith.constant 0 : index
    %c0_66 = arith.constant 0 : index
    %315 = vector.load %arg10[%c0_65, %c0_66] : memref<2x4xf32, #tpu.memory_space<vmem>>, vector<2x4xf32>
    tpu.vector_store %arg10[%c0_65, %c0_66], %314 {strides = array<i32>} : memref<2x4xf32, #tpu.memory_space<vmem>>, vector<2x4xf32>,
    return
  }
}

</mosaic_0001>

<bundles_post_ra>
// kernel: tpu_custom_call.1
= control target key start
LH: loop header
LB: loop body
LE: loop exit
PB: predicated region body
PF: predicated region fallthrough
CT: control target
= control target key end

     0   :  { %15 = vsyncpa [#allocation4], 0  ;;  %s1529_s0 = inlined_call_operand.vmem [shape: f32[16,4], index: 0, kind: input, shape index: {}]   ;;  %s1530_s1 = inlined_call_operand.vmem [shape: f32[4,128], index: 1, kind: input, shape index: {}]   ;;  %s1531_s2 = inlined_call_operand.vmem [shape: f32[32,128], index: 2, kind: input, shape index: {}]   ;;  %s1532_s3 = inlined_call_operand.vmem [shape: f32[1,128], index: 3, kind: input, shape index: {}]   ;;  %s1533_s4 = inlined_call_operand.hbm [shape: f32[64,128], index: 4, kind: input, shape index: {}]   ;;  %s1534_s5 = inlined_call_operand.vmem [shape: f32[1,128], index: 5, kind: input, shape index: {}]   ;;  %s1535_s6 = inlined_call_operand.vmem [shape: f32[2,2,32], index: 6, kind: input, shape index: {}]   ;;  %s1536_s7 = inlined_call_operand.vmem [shape: f32[2,2,32], index: 7, kind: input, shape index: {}]   ;;  %s1537_s8 = inlined_call_operand.vmem [shape: f32[32,4], index: 8, kind: input, shape index: {}]   ;;  %s1538_s9 = inlined_call_operand.vmem [shape: f32[1,4], index: 9, kind: input, shape index: {}]   ;;  %s1539_s10 = inlined_call_operand.hbm [shape: f32[2,4], index: 10, kind: output, shape index: {}]  }
   0x1   :  { %16 = vsyncpa [#allocation5], 0  ;;  %s29_s15 = sshll.u32 %s1533_s4, 4  ;;  %s1119_s16 = smov [#allocation3]   ;;  %s30_s15 = int_to_ptr.hbm [resolvable:$true] %s29_s15 }
   0x2   :  { %s31_s17 = sshll.u32 %s1119_s16, 4  ;;  %s1120_s18 = smov 128   ;;  %s32_s17 = int_to_ptr.vmem [resolvable:$true] %s31_s17 }
   0x3   :  { %s1121_s19 = smov 8  }
   0x4   :  { %37 = dma.hbm_to_vmem [thread:$0]  %s30_s15, 1024, %s32_s17, [#allocation4], %s1120_s18, %s1120_s18, %s1121_s19  }
   0x5   :  { %1115 = dma.done.wait [#allocation4], 1024  }
   0x6   :  { %1116 = vsyncadd [#allocation4], 4294966272  ;;  %vm66_vm0 = vcmask 1043456   ;;  %vm59_vm1 = vcmask 31744   ;;  %v54_v0 = vld [vmem:[%s1530_s1] sm:$0xf]  ;;  %v108_v7 = vlaneseq }
   0x7   :  { %v52_v1 = vld [vmem:[%s1529_s0] sm:$0xff]  ;;  %v1193_v2 = vld [vmem:[%s1531_s2 + $0x18] sm:$0xff]  ;;  %971 = vmatpush.msk.msra.mxu0 %vm66_vm0, %v54_v0  ;;  %v1199_v3 = vld [vmem:[%s1531_s2 + $0x10] sm:$0xff]  ;;  %vm122_vm2 = vcmask 261120   ;;  %v1122_v13 = vmov 0.5   ;;  %s1124_s15 = smov 32  }
   0x8   :  { %138 = vmatpush.msra.mxu1 %v1193_v2  ;;  %972 = vmatmul.msk.f32.vlgmr.msra.gmra.mxu0 %vm59_vm1, %v52_v1  ;;  %v1205_v4 = vld [vmem:[%s1531_s2 + $0x8] sm:$0xff]  ;;  %v1212_v5 = vld [vmem:[%s1531_s2] sm:$0xff]  ;;  %v109_v10 = vand.u32 127, %v108_v7  ;;  %v1260_v32 = vld [vmem:[#allocation3 + $0x28] sm:$0xff]  ;;  %vm184_vm6 = vcmask 523264   ;;  %s1125_s28 = smov [#allocation6]  }
   0x9   :  { %248 = vmatpush.msra.mxu3 %v1193_v2  ;;  %v115_v6 = vld [vmem:[%s1535_s6] sm:$0x3]  ;;  %v1254_v30 = vld [vmem:[#allocation3 + $0x38] sm:$0xff]  ;;  %v974_v35 = vld [vmem:[%s1535_s6 + $0x2] sm:$0x3]  ;;  %s959_s29 = sshll.u32 %s1125_s28, 4  ;;  %s960_s29 = int_to_ptr.vmem [resolvable:$true] %s959_s29 }
   0xa   :  { %139 = vmatpush.msra.mxu1 %v1199_v3  ;;  %v1234_v8 = vld [vmem:[%s1532_s3] ss:$0 sm:$0xff]  ;;  %vm110_vm3 = vcmp.ge.s32.totalorder %v109_v10, 64  ;;  %vm111_vm4 = vcmp.lt.s32.totalorder %v109_v10, 96  ;;  %s1123_s3 = smov 64   ;;  %196 = vmatpush.msra.mxu2 %v1254_v30  ;;  %v1274_v36 = vld [vmem:[#allocation3 + $0x20] sm:$0xff] }
   0xb   :  { %249 = vmatpush.msra.mxu3 %v1199_v3  ;;  %vm112_vm5 = vmand %vm110_vm3, %vm111_vm4  ;;  %v116_v22 = vld [vmem:[%s1536_s7] sm:$0x3]  ;;  %298 = vmatpush.msrb.mxu0 %v1254_v30  ;;  %v1277_v37 = vld [vmem:[#allocation3 + $0x18] sm:$0xff]  ;;  %s961_s2 = sshll.u32 %s1539_s10, 4  ;;  %vm952_vm7 = vcmask 25600   ;;  %s962_s2 = int_to_ptr.hbm [resolvable:$true] %s961_s2 }
   0xc   :  { %140 = vmatpush.msra.mxu1 %v1205_v4  ;;  %v1237_v14 = vsel %vm112_vm5, 1.0, %v1122_v13  ;;  %v1240_v19 = vsel %vm112_vm5, 0.0, %v1122_v13  ;;  %v1256_v31 = vld [vmem:[#allocation3 + $0x30] sm:$0xff]  ;;  %v1285_v39 = vld [vmem:[#allocation3 + $0x8] sm:$0xff]  ;;  %v1293_v40 = vld [vmem:[#allocation3] sm:$0xff] }
   0xd   :  { %250 = vmatpush.msra.mxu3 %v1205_v4  ;;  %197 = vmatpush.msra.mxu2 %v1256_v31  ;;  %v1280_v38 = vld [vmem:[#allocation3 + $0x10] sm:$0xff] }
   0xe   :  { %141 = vmatpush.msra.mxu1 %v1212_v5  ;;  %299 = vmatpush.msrb.mxu0 %v1256_v31  ;;  %v975_v41 = vld [vmem:[%s1536_s7 + $0x2] sm:$0x3]  ;;  %v1330_v49 = vld [vmem:[%s1534_s5] ss:$0 sm:$0xff] }
   0xf   :  { %976 = vmatmul.msk.f32.vlgmr.msra.gmra.mxu1 %vm122_vm2, %v115_v6  ;;  %251 = vmatpush.msra.mxu3 %v1212_v5 }
  0x10   :  { %346 = vmatpush.msrb.mxu1 %v1193_v2  ;;  %198 = vmatpush.msra.mxu2 %v1260_v32 }
  0x11   :  { %396 = vmatpush.msrb.mxu3 %v1254_v30  ;;  %300 = vmatpush.msrb.mxu0 %v1260_v32 }
  0x12   :  { %347 = vmatpush.msrb.mxu1 %v1199_v3  ;;  %199 = vmatpush.msra.mxu2 %v1274_v36 }
  0x13   :  { %397 = vmatpush.msrb.mxu3 %v1256_v31  ;;  %301 = vmatpush.msrb.mxu0 %v1274_v36 }
  0x14   :  { %348 = vmatpush.msrb.mxu1 %v1205_v4  ;;  %200 = vmatpush.msra.mxu2 %v1277_v37 }
  0x15   :  { %398 = vmatpush.msrb.mxu3 %v1260_v32  ;;  %302 = vmatpush.msrb.mxu0 %v1277_v37 }
  0x16   :  { %349 = vmatpush.msrb.mxu1 %v1212_v5  ;;  %201 = vmatpush.msra.mxu2 %v1280_v38 }
  0x17   :  { %399 = vmatpush.msrb.mxu3 %v1274_v36  ;;  %303 = vmatpush.msrb.mxu0 %v1280_v38 }
  0x18   :  { %444 = vmatpush.msra.mxu1 %v1193_v2  ;;  %202 = vmatpush.msra.mxu2 %v1285_v39 }
  0x19   :  { %400 = vmatpush.msrb.mxu3 %v1277_v37  ;;  %304 = vmatpush.msrb.mxu0 %v1285_v39 }
  0x1a   :  { %445 = vmatpush.msra.mxu1 %v1199_v3  ;;  %203 = vmatpush.msra.mxu2 %v1293_v40 }
  0x1b   :  { %401 = vmatpush.msrb.mxu3 %v1280_v38  ;;  %305 = vmatpush.msrb.mxu0 %v1293_v40 }
  0x1c   :  { %446 = vmatpush.msra.mxu1 %v1205_v4  ;;  %494 = vmatpush.msrb.mxu2 %v1254_v30 }
  0x1d   :  { %402 = vmatpush.msrb.mxu3 %v1285_v39  ;;  %542 = vmatpush.msra.mxu0 %v1193_v2 }
  0x1e   :  { %447 = vmatpush.msra.mxu1 %v1212_v5  ;;  %495 = vmatpush.msrb.mxu2 %v1256_v31 }
  0x1f   :  { %403 = vmatpush.msrb.mxu3 %v1293_v40  ;;  %543 = vmatpush.msra.mxu0 %v1199_v3 }
  0x20   :  { %496 = vmatpush.msrb.mxu2 %v1260_v32 }
  0x21   :  { %544 = vmatpush.msra.mxu0 %v1205_v4 }
  0x22   :  { %497 = vmatpush.msrb.mxu2 %v1274_v36 }
  0x23   :  { %545 = vmatpush.msra.mxu0 %v1212_v5 }
  0x24   :  { %498 = vmatpush.msrb.mxu2 %v1277_v37 }
  0x26   :  { %499 = vmatpush.msrb.mxu2 %v1280_v38 }
  0x28   :  { %500 = vmatpush.msrb.mxu2 %v1285_v39 }
  0x2a   :  { %501 = vmatpush.msrb.mxu2 %v1293_v40 }
  0x85   :  { %v87_v9 = vpop.f32.mrf.mxu0 }
  0x86   :  { %v88_v11 = vadd.f32 %v1234_v8, %v87_v9 }
  0x88   :  { %93 = vst [vmem:[#allocation2] sm:$0xff] %v88_v11 }
  0x8c   :  { %v143_v12 = vpop.f32.mrf.mxu1 }
  0x8f   :  { %v121_v15 = vld [vmem:[#allocation2] sm:$0x3]  ;;  %v233_v45 = vld [vmem:[#allocation2 + $0x2] sm:$0x3] }
  0x90   :  { %v146_v16 = vadd.f32 %v143_v12, %v121_v15 }
  0x92   :  { %v147_v17 = vmul.f32 %v146_v16, %v1237_v14 }
  0x94   :  { %1003 = vtanh.f32 %v147_v17 }
  0x9a   :  { %v1004_v18 = vpop.eup %1003 }
  0x9b   :  { %v149_v20 = vmul.f32 %v1004_v18, %v1237_v14  ;;  %v53_v18 = vld [vmem:[%s1529_s0 + $0x8] sm:$0xff] }
  0x9c   :  { %973 = vmatmul.msk.f32.gmra.mxu0 %vm59_vm1, %v53_v18 }
  0x9d   :  { %v150_v21 = vadd.f32 %v149_v20, %v1240_v19 }
  0x9f   :  { %157 = vrot.lane.b32.xlu0 %v150_v21, %s1123_s3 }
  0xa7   :  { %152 = vrot.lane.b32.xlu0 %v116_v22, %s1124_s15 }
 0x111   :  { %v158_v23 = vpop.permute.xlu0 %157 }
 0x112   :  { %v160_v24 = vmul.f32 %v158_v23, %v150_v21 }
 0x114   :  { %162 = vrot.lane.b32.xlu1 %v160_v24, %s1124_s15 }
 0x119   :  { %v153_v25 = vpop.permute.xlu0 %152  ;;  %v90_v23 = vpop.f32.mrf.mxu0 }
 0x11a   :  { %v155_v26 = vmul.f32 %v153_v25, %v150_v21  ;;  %v91_v24 = vadd.f32 %v1234_v8, %v90_v23  ;;  %v331_v25 = vld [vmem:[#allocation2 + $0x4] sm:$0x3] }
 0x11c   :  { %94 = vst [vmem:[#allocation2 + $0x8] sm:$0xff] %v91_v24 }
 0x186   :  { %v163_v27 = vpop.permute.xlu1 %162 }
 0x187   :  { %v1250_v28 = vadd.f32 %v163_v27, %v155_v26 }
 0x189   :  { %1005 = vtanh.f32 %v1250_v28 }
 0x18f   :  { %v1006_v29 = vpop.eup %1005 }
 0x190   :  { %168 = vrot.lane.b32.xlu1 %v1006_v29, %s1123_s3 }
 0x202   :  { %v169_v33 = vpop.permute.xlu1 %168 }
 0x203   :  { %v171_v34 = vmul.f32 %v169_v33, %v150_v21 }
 0x205   :  { %173 = vrot.lane.b32.xlu2 %v171_v34, %s1124_s15 }
 0x20d   :  { %177 = vrot.lane.b32.xlu2 %v974_v35, %s1124_s15 }
 0x215   :  { %213 = vrot.lane.b32.xlu2 %v975_v41, %s1124_s15 }
 0x25f   :  { %v174_v42 = vpop.permute.xlu2 %173 }
 0x260   :  { %978 = vmatmul.msk.f32.vlgmr.msra.gmra.mxu3 %vm122_vm2, %v174_v42 }
 0x261   :  { %640 = vmatpush.msra.mxu3 %v1193_v2 }
 0x263   :  { %641 = vmatpush.msra.mxu3 %v1199_v3 }
 0x265   :  { %642 = vmatpush.msra.mxu3 %v1205_v4 }
 0x267   :  { %v178_v43 = vpop.permute.xlu2 %177  ;;  %643 = vmatpush.msra.mxu3 %v1212_v5 }
 0x268   :  { %v180_v44 = vsel %vm122_vm2, %v174_v42, %v178_v43 }
 0x269   :  { %977 = vmatmul.msk.f32.vlgmr.msra.gmra.mxu2 %vm184_vm6, %v180_v44 }
 0x26a   :  { %738 = vmatpush.msra.mxu2 %v1193_v2 }
 0x26c   :  { %739 = vmatpush.msra.mxu2 %v1199_v3 }
 0x26e   :  { %740 = vmatpush.msra.mxu2 %v1205_v4 }
 0x26f   :  { %v214_v6 = vpop.permute.xlu2 %213 }
 0x270   :  { %741 = vmatpush.msra.mxu2 %v1212_v5 }
 0x2e3   :  { %v253_v46 = vpop.f32.mrf.mxu3 }
 0x2e4   :  { %v256_v47 = vadd.f32 %v253_v46, %v233_v45 }
 0x2e6   :  { %v257_v48 = vmul.f32 %v256_v47, %v1237_v14 }
 0x2e8   :  { %1007 = vtanh.f32 %v257_v48 }
 0x2ec   :  { %v205_v50 = vpop.f32.mrf.mxu2 }
 0x2ed   :  { %v206_v51 = vadd.f32 %v1330_v49, %v205_v50 }
 0x2ee   :  { %v1008_v52 = vpop.eup %1007 }
 0x2ef   :  { %v208_v53 = vmul.f32 %v206_v51, %v1237_v14  ;;  %v259_v54 = vmul.f32 %v1008_v52, %v1237_v14 }
 0x2f1   :  { %1009 = vtanh.f32 %v208_v53  ;;  %v260_v55 = vadd.f32 %v259_v54, %v1240_v19 }
 0x2f3   :  { %263 = vrot.lane.b32.xlu1 %v260_v55, %s1123_s3  ;;  %v261_v63 = vmul.f32 %v260_v55, %v1250_v28 }
 0x2f7   :  { %v1010_v56 = vpop.eup %1009 }
 0x2f8   :  { %v210_v57 = vmul.f32 %v1010_v56, %v1237_v14 }
 0x2fa   :  { %v211_v58 = vadd.f32 %v210_v57, %v1240_v19 }
 0x2fc   :  { %218 = vrot.lane.b32.xlu0 %v211_v58, %s1123_s3  ;;  %v216_v7 = vmul.f32 %v214_v6, %v211_v58 }
 0x365   :  { %v264_v59 = vpop.permute.xlu1 %263 }
 0x366   :  { %v266_v60 = vmul.f32 %v264_v59, %v260_v55 }
 0x368   :  { %268 = vrot.lane.b32.xlu1 %v266_v60, %s1124_s15 }
 0x36e   :  { %v219_v61 = vpop.permute.xlu0 %218 }
 0x36f   :  { %v221_v62 = vmul.f32 %v219_v61, %v211_v58 }
 0x371   :  { %223 = vrot.lane.b32.xlu0 %v221_v62, %s1124_s15 }
 0x3da   :  { %v269_v0 = vpop.permute.xlu1 %268 }
 0x3db   :  { %v1343_v1 = vadd.f32 %v269_v0, %v261_v63 }
 0x3dd   :  { %1011 = vtanh.f32 %v1343_v1 }
 0x3e3   :  { %v1012_v9 = vpop.eup %1011  ;;  %v224_v10 = vpop.permute.xlu0 %223 }
 0x3e4   :  { %v226_v11 = vadd.f32 %v224_v10, %v216_v7  ;;  %274 = vrot.lane.b32.xlu0 %v1012_v9, %s1123_s3 }
 0x3e6   :  { %1013 = vtanh.f32 %v226_v11 }
 0x3ec   :  { %v1014_v12 = vpop.eup %1013 }
 0x3ed   :  { %229 = vrot.lane.b32.xlu2 %v1014_v12, %s1123_s3 }
 0x447   :  { %v230_v13 = vpop.permute.xlu2 %229 }
 0x448   :  { %v232_v15 = vmul.f32 %v230_v13, %v211_v58 }
 0x44a   :  { %283 = vrot.lane.b32.xlu2 %v232_v15, %s1123_s3 }
 0x456   :  { %v275_v16 = vpop.permute.xlu0 %274 }
 0x457   :  { %v277_v17 = vmul.f32 %v275_v16, %v260_v55 }
 0x459   :  { %279 = vrot.lane.b32.xlu1 %v277_v17, %s1124_s15 }
 0x4a4   :  { %v284_v20 = vpop.permute.xlu2 %283 }
 0x4cb   :  { %v280_v21 = vpop.permute.xlu1 %279 }
 0x4cc   :  { %v286_v22 = vsel %vm122_vm2, %v280_v21, %v284_v20  ;;  %980 = vmatmul.msk.f32.vlgmr.msrb.gmra.mxu1 %vm122_vm2, %v280_v21 }
 0x4cd   :  { %979 = vmatmul.msk.f32.vlgmr.msrb.gmra.mxu0 %vm184_vm6, %v286_v22  ;;  %592 = vmatpush.msrb.mxu1 %v1254_v30 }
 0x4ce   :  { %690 = vmatpush.msrb.mxu0 %v1254_v30 }
 0x4cf   :  { %593 = vmatpush.msrb.mxu1 %v1256_v31 }
 0x4d0   :  { %691 = vmatpush.msrb.mxu0 %v1256_v31 }
 0x4d1   :  { %594 = vmatpush.msrb.mxu1 %v1260_v32 }
 0x4d2   :  { %692 = vmatpush.msrb.mxu0 %v1260_v32 }
 0x4d3   :  { %595 = vmatpush.msrb.mxu1 %v1274_v36 }
 0x4d4   :  { %693 = vmatpush.msrb.mxu0 %v1274_v36 }
 0x4d5   :  { %596 = vmatpush.msrb.mxu1 %v1277_v37 }
 0x4d6   :  { %694 = vmatpush.msrb.mxu0 %v1277_v37 }
 0x4d7   :  { %597 = vmatpush.msrb.mxu1 %v1280_v38 }
 0x4d8   :  { %695 = vmatpush.msrb.mxu0 %v1280_v38 }
 0x4d9   :  { %598 = vmatpush.msrb.mxu1 %v1285_v39 }
 0x4da   :  { %696 = vmatpush.msrb.mxu0 %v1285_v39 }
 0x4db   :  { %599 = vmatpush.msrb.mxu1 %v1293_v40 }
 0x4dc   :  { %697 = vmatpush.msrb.mxu0 %v1293_v40 }
 0x549   :  { %v351_v26 = vpop.f32.mrf.mxu1 }
 0x54a   :  { %v354_v27 = vadd.f32 %v351_v26, %v331_v25  ;;  %v307_v28 = vpop.f32.mrf.mxu0 }
 0x54b   :  { %v308_v29 = vadd.f32 %v1330_v49, %v307_v28 }
 0x54c   :  { %v355_v33 = vmul.f32 %v354_v27, %v1237_v14 }
 0x54d   :  { %v310_v34 = vmul.f32 %v308_v29, %v1237_v14 }
 0x54e   :  { %1015 = vtanh.f32 %v355_v33 }
 0x54f   :  { %1017 = vtanh.f32 %v310_v34 }
 0x554   :  { %v1016_v35 = vpop.eup %1015 }
 0x555   :  { %v1018_v41 = vpop.eup %1017  ;;  %v357_v42 = vmul.f32 %v1016_v35, %v1237_v14 }
 0x556   :  { %v312_v43 = vmul.f32 %v1018_v41, %v1237_v14 }
 0x557   :  { %v358_v8 = vadd.f32 %v357_v42, %v1240_v19 }
 0x558   :  { %v313_v44 = vadd.f32 %v312_v43, %v1240_v19 }
 0x559   :  { %361 = vrot.lane.b32.xlu1 %v358_v8, %s1123_s3  ;;  %v359_v54 = vmul.f32 %v358_v8, %v1343_v1 }
 0x55a   :  { %316 = vrot.lane.b32.xlu0 %v313_v44, %s1123_s3  ;;  %v314_v50 = vmul.f32 %v313_v44, %v226_v11 }
 0x5cb   :  { %v362_v45 = vpop.permute.xlu1 %361 }
 0x5cc   :  { %v364_v46 = vmul.f32 %v362_v45, %v358_v8  ;;  %v317_v47 = vpop.permute.xlu0 %316 }
 0x5cd   :  { %v319_v48 = vmul.f32 %v317_v47, %v313_v44 }
 0x5ce   :  { %366 = vrot.lane.b32.xlu0 %v364_v46, %s1124_s15 }
 0x5cf   :  { %321 = vrot.lane.b32.xlu2 %v319_v48, %s1124_s15 }
 0x629   :  { %v322_v51 = vpop.permute.xlu2 %321 }
 0x62a   :  { %v324_v52 = vadd.f32 %v322_v51, %v314_v50 }
 0x62c   :  { %1019 = vtanh.f32 %v324_v52 }
 0x632   :  { %v1020_v53 = vpop.eup %1019 }
 0x633   :  { %327 = vrot.lane.b32.xlu1 %v1020_v53, %s1123_s3 }
 0x640   :  { %v367_v55 = vpop.permute.xlu0 %366 }
 0x641   :  { %v369_v56 = vadd.f32 %v367_v55, %v359_v54 }
 0x643   :  { %1021 = vtanh.f32 %v369_v56 }
 0x649   :  { %v1022_v57 = vpop.eup %1021 }
 0x64a   :  { %372 = vrot.lane.b32.xlu2 %v1022_v57, %s1123_s3 }
 0x6a4   :  { %v373_v58 = vpop.permute.xlu2 %372 }
 0x6a5   :  { %v375_v59 = vmul.f32 %v373_v58, %v358_v8  ;;  %v328_v60 = vpop.permute.xlu1 %327  ;;  %v527_v8 = vld [vmem:[#allocation2 + $0x8] sm:$0x3] }
 0x6a6   :  { %v330_v61 = vmul.f32 %v328_v60, %v313_v44 }
 0x6a7   :  { %377 = vrot.lane.b32.xlu0 %v375_v59, %s1124_s15 }
 0x6a8   :  { %381 = vrot.lane.b32.xlu1 %v330_v61, %s1123_s3 }
 0x719   :  { %v378_v62 = vpop.permute.xlu0 %377 }
 0x71a   :  { %982 = vmatmul.msk.f32.vlgmr.msra.gmra.mxu1 %vm122_vm2, %v378_v62  ;;  %v382_v63 = vpop.permute.xlu1 %381 }
 0x71b   :  { %v384_v0 = vsel %vm122_vm2, %v378_v62, %v382_v63  ;;  %836 = vmatpush.msra.mxu1 %v1193_v2  ;;  %v429_v2 = vld [vmem:[#allocation2 + $0x6] sm:$0x3] }
 0x71c   :  { %981 = vmatmul.msk.f32.vlgmr.msrb.gmra.mxu3 %vm184_vm6, %v384_v0 }
 0x71d   :  { %837 = vmatpush.msra.mxu1 %v1199_v3  ;;  %788 = vmatpush.msrb.mxu3 %v1254_v30 }
 0x71f   :  { %838 = vmatpush.msra.mxu1 %v1205_v4  ;;  %789 = vmatpush.msrb.mxu3 %v1256_v31 }
 0x721   :  { %839 = vmatpush.msra.mxu1 %v1212_v5  ;;  %790 = vmatpush.msrb.mxu3 %v1260_v32 }
 0x723   :  { %791 = vmatpush.msrb.mxu3 %v1274_v36 }
 0x725   :  { %792 = vmatpush.msrb.mxu3 %v1277_v37 }
 0x727   :  { %793 = vmatpush.msrb.mxu3 %v1280_v38 }
 0x729   :  { %794 = vmatpush.msrb.mxu3 %v1285_v39 }
 0x72b   :  { %795 = vmatpush.msrb.mxu3 %v1293_v40 }
 0x797   :  { %v449_v3 = vpop.f32.mrf.mxu1 }
 0x798   :  { %v452_v1 = vadd.f32 %v449_v3, %v429_v2 }
 0x79a   :  { %v453_v4 = vmul.f32 %v452_v1, %v1237_v14 }
 0x79c   :  { %1023 = vtanh.f32 %v453_v4  ;;  %v625_v4 = vld [vmem:[#allocation2 + $0xa] sm:$0x3] }
 0x79f   :  { %v405_v6 = vpop.f32.mrf.mxu3 }
 0x7a0   :  { %v406_v5 = vadd.f32 %v1330_v49, %v405_v6 }
 0x7a2   :  { %v1024_v7 = vpop.eup %1023  ;;  %v408_v9 = vmul.f32 %v406_v5, %v1237_v14 }
 0x7a3   :  { %v455_v10 = vmul.f32 %v1024_v7, %v1237_v14 }
 0x7a4   :  { %1025 = vtanh.f32 %v408_v9 }
 0x7a5   :  { %v456_v11 = vadd.f32 %v455_v10, %v1240_v19 }
 0x7a7   :  { %459 = vrot.lane.b32.xlu2 %v456_v11, %s1123_s3  ;;  %v457_v21 = vmul.f32 %v456_v11, %v369_v56 }
 0x7aa   :  { %v1026_v12 = vpop.eup %1025 }
 0x7ab   :  { %v410_v13 = vmul.f32 %v1026_v12, %v1237_v14 }
 0x7ad   :  { %v411_v15 = vadd.f32 %v410_v13, %v1240_v19 }
 0x7af   :  { %414 = vrot.lane.b32.xlu0 %v411_v15, %s1123_s3  ;;  %v412_v24 = vmul.f32 %v411_v15, %v324_v52 }
 0x801   :  { %v460_v16 = vpop.permute.xlu2 %459 }
 0x802   :  { %v462_v17 = vmul.f32 %v460_v16, %v456_v11 }
 0x804   :  { %464 = vrot.lane.b32.xlu1 %v462_v17, %s1124_s15 }
 0x821   :  { %v415_v18 = vpop.permute.xlu0 %414 }
 0x822   :  { %v417_v20 = vmul.f32 %v415_v18, %v411_v15 }
 0x824   :  { %419 = vrot.lane.b32.xlu2 %v417_v20, %s1124_s15 }
 0x876   :  { %v465_v22 = vpop.permute.xlu1 %464 }
 0x877   :  { %v467_v23 = vadd.f32 %v465_v22, %v457_v21 }
 0x879   :  { %1027 = vtanh.f32 %v467_v23 }
 0x87e   :  { %v420_v25 = vpop.permute.xlu2 %419 }
 0x87f   :  { %v1028_v26 = vpop.eup %1027  ;;  %v422_v27 = vadd.f32 %v420_v25, %v412_v24 }
 0x880   :  { %470 = vrot.lane.b32.xlu0 %v1028_v26, %s1123_s3 }
 0x881   :  { %1029 = vtanh.f32 %v422_v27 }
 0x887   :  { %v1030_v28 = vpop.eup %1029 }
 0x888   :  { %425 = vrot.lane.b32.xlu1 %v1030_v28, %s1123_s3 }
 0x8f2   :  { %v471_v29 = vpop.permute.xlu0 %470 }
 0x8f3   :  { %v473_v33 = vmul.f32 %v471_v29, %v456_v11 }
 0x8f5   :  { %475 = vrot.lane.b32.xlu2 %v473_v33, %s1124_s15 }
 0x8fa   :  { %v426_v34 = vpop.permute.xlu1 %425 }
 0x8fb   :  { %v428_v35 = vmul.f32 %v426_v34, %v411_v15 }
 0x8fd   :  { %479 = vrot.lane.b32.xlu0 %v428_v35, %s1123_s3 }
 0x94f   :  { %v476_v41 = vpop.permute.xlu2 %475 }
 0x950   :  { %984 = vmatmul.msk.f32.vlgmr.msra.gmra.mxu0 %vm122_vm2, %v476_v41 }
 0x96f   :  { %v480_v42 = vpop.permute.xlu0 %479 }
 0x970   :  { %v482_v43 = vsel %vm122_vm2, %v476_v41, %v480_v42 }
 0x971   :  { %983 = vmatmul.msk.f32.vlgmr.msrb.gmra.mxu2 %vm184_vm6, %v482_v43 }
 0x972   :  { %886 = vmatpush.msrb.mxu2 %v1254_v30 }
 0x974   :  { %887 = vmatpush.msrb.mxu2 %v1256_v31 }
 0x976   :  { %888 = vmatpush.msrb.mxu2 %v1260_v32 }
 0x978   :  { %889 = vmatpush.msrb.mxu2 %v1274_v36 }
 0x97a   :  { %890 = vmatpush.msrb.mxu2 %v1277_v37 }
 0x97c   :  { %891 = vmatpush.msrb.mxu2 %v1280_v38 }
 0x97e   :  { %892 = vmatpush.msrb.mxu2 %v1285_v39 }
 0x980   :  { %893 = vmatpush.msrb.mxu2 %v1293_v40 }
 0x9cd   :  { %v547_v44 = vpop.f32.mrf.mxu0 }
 0x9ce   :  { %v550_v45 = vadd.f32 %v547_v44, %v527_v8 }
 0x9d0   :  { %v551_v46 = vmul.f32 %v550_v45, %v1237_v14 }
 0x9d2   :  { %1031 = vtanh.f32 %v551_v46  ;;  %v723_v46 = vld [vmem:[#allocation2 + $0xc] sm:$0x3] }
 0x9d8   :  { %v1032_v30 = vpop.eup %1031 }
 0x9d9   :  { %v553_v31 = vmul.f32 %v1032_v30, %v1237_v14 }
 0x9db   :  { %v554_v32 = vadd.f32 %v553_v31, %v1240_v19 }
 0x9dd   :  { %557 = vrot.lane.b32.xlu1 %v554_v32, %s1123_s3  ;;  %v555_v53 = vmul.f32 %v554_v32, %v467_v23 }
 0x9f4   :  { %v503_v36 = vpop.f32.mrf.mxu2 }
 0x9f5   :  { %v504_v37 = vadd.f32 %v1330_v49, %v503_v36 }
 0x9f7   :  { %v506_v38 = vmul.f32 %v504_v37, %v1237_v14 }
 0x9f9   :  { %1033 = vtanh.f32 %v506_v38 }
 0x9ff   :  { %v1034_v39 = vpop.eup %1033 }
 0xa00   :  { %v508_v40 = vmul.f32 %v1034_v39, %v1237_v14 }
 0xa02   :  { %v509_v47 = vadd.f32 %v508_v40, %v1240_v19 }
 0xa04   :  { %512 = vrot.lane.b32.xlu2 %v509_v47, %s1123_s3  ;;  %v510_v57 = vmul.f32 %v509_v47, %v422_v27 }
 0xa4f   :  { %v558_v48 = vpop.permute.xlu1 %557 }
 0xa50   :  { %v560_v50 = vmul.f32 %v558_v48, %v554_v32 }
 0xa52   :  { %562 = vrot.lane.b32.xlu0 %v560_v50, %s1124_s15 }
 0xa5e   :  { %v513_v51 = vpop.permute.xlu2 %512 }
 0xa5f   :  { %v515_v52 = vmul.f32 %v513_v51, %v509_v47 }
 0xa61   :  { %517 = vrot.lane.b32.xlu1 %v515_v52, %s1124_s15 }
 0xac4   :  { %v563_v54 = vpop.permute.xlu0 %562 }
 0xac5   :  { %v565_v55 = vadd.f32 %v563_v54, %v555_v53 }
 0xac7   :  { %1035 = vtanh.f32 %v565_v55 }
 0xacd   :  { %v1036_v56 = vpop.eup %1035 }
 0xace   :  { %568 = vrot.lane.b32.xlu2 %v1036_v56, %s1123_s3 }
 0xad3   :  { %v518_v58 = vpop.permute.xlu1 %517 }
 0xad4   :  { %v520_v59 = vadd.f32 %v518_v58, %v510_v57 }
 0xad6   :  { %1037 = vtanh.f32 %v520_v59 }
 0xadc   :  { %v1038_v60 = vpop.eup %1037 }
 0xadd   :  { %523 = vrot.lane.b32.xlu0 %v1038_v60, %s1123_s3 }
 0xb28   :  { %v569_v61 = vpop.permute.xlu2 %568 }
 0xb29   :  { %v571_v62 = vmul.f32 %v569_v61, %v554_v32 }
 0xb2b   :  { %573 = vrot.lane.b32.xlu1 %v571_v62, %s1124_s15 }
 0xb4f   :  { %v524_v63 = vpop.permute.xlu0 %523 }
 0xb50   :  { %v526_v0 = vmul.f32 %v524_v63, %v509_v47 }
 0xb52   :  { %577 = vrot.lane.b32.xlu2 %v526_v0, %s1123_s3 }
 0xb9d   :  { %v574_v2 = vpop.permute.xlu1 %573 }
 0xb9e   :  { %986 = vmatmul.msk.f32.vlgmr.msra.gmra.mxu3 %vm122_vm2, %v574_v2 }
 0xbac   :  { %v578_v3 = vpop.permute.xlu2 %577 }
 0xbad   :  { %v580_v1 = vsel %vm122_vm2, %v574_v2, %v578_v3 }
 0xbae   :  { %985 = vmatmul.msk.f32.vlgmr.msrb.gmra.mxu1 %vm184_vm6, %v580_v1 }
 0xc21   :  { %v645_v6 = vpop.f32.mrf.mxu3 }
 0xc22   :  { %v648_v5 = vadd.f32 %v645_v6, %v625_v4 }
 0xc24   :  { %v649_v7 = vmul.f32 %v648_v5, %v1237_v14 }
 0xc26   :  { %1039 = vtanh.f32 %v649_v7  ;;  %v821_v7 = vld [vmem:[#allocation2 + $0xe] sm:$0x3] }
 0xc2b   :  { %v601_v9 = vpop.f32.mrf.mxu1 }
 0xc2c   :  { %v1040_v10 = vpop.eup %1039  ;;  %v602_v11 = vadd.f32 %v1330_v49, %v601_v9 }
 0xc2d   :  { %v651_v12 = vmul.f32 %v1040_v10, %v1237_v14 }
 0xc2e   :  { %v604_v13 = vmul.f32 %v602_v11, %v1237_v14 }
 0xc2f   :  { %v652_v15 = vadd.f32 %v651_v12, %v1240_v19 }
 0xc30   :  { %1041 = vtanh.f32 %v604_v13 }
 0xc31   :  { %655 = vrot.lane.b32.xlu0 %v652_v15, %s1123_s3  ;;  %v653_v24 = vmul.f32 %v652_v15, %v565_v55 }
 0xc36   :  { %v1042_v16 = vpop.eup %1041 }
 0xc37   :  { %v606_v17 = vmul.f32 %v1042_v16, %v1237_v14 }
 0xc39   :  { %v607_v18 = vadd.f32 %v606_v17, %v1240_v19 }
 0xc3b   :  { %610 = vrot.lane.b32.xlu1 %v607_v18, %s1123_s3  ;;  %v608_v28 = vmul.f32 %v607_v18, %v520_v59 }
 0xca3   :  { %v656_v20 = vpop.permute.xlu0 %655 }
 0xca4   :  { %v658_v21 = vmul.f32 %v656_v20, %v652_v15 }
 0xca6   :  { %660 = vrot.lane.b32.xlu2 %v658_v21, %s1124_s15 }
 0xcad   :  { %v611_v22 = vpop.permute.xlu1 %610 }
 0xcae   :  { %v613_v23 = vmul.f32 %v611_v22, %v607_v18 }
 0xcb0   :  { %615 = vrot.lane.b32.xlu0 %v613_v23, %s1124_s15 }
 0xd00   :  { %v661_v25 = vpop.permute.xlu2 %660 }
 0xd01   :  { %v663_v26 = vadd.f32 %v661_v25, %v653_v24 }
 0xd03   :  { %1043 = vtanh.f32 %v663_v26 }
 0xd09   :  { %v1044_v27 = vpop.eup %1043 }
 0xd0a   :  { %666 = vrot.lane.b32.xlu1 %v1044_v27, %s1123_s3 }
 0xd22   :  { %v616_v29 = vpop.permute.xlu0 %615 }
 0xd23   :  { %v618_v33 = vadd.f32 %v616_v29, %v608_v28 }
 0xd25   :  { %1045 = vtanh.f32 %v618_v33 }
 0xd2b   :  { %v1046_v34 = vpop.eup %1045 }
 0xd2c   :  { %621 = vrot.lane.b32.xlu2 %v1046_v34, %s1123_s3 }
 0xd7c   :  { %v667_v35 = vpop.permute.xlu1 %666 }
 0xd7d   :  { %v669_v41 = vmul.f32 %v667_v35, %v652_v15 }
 0xd7f   :  { %671 = vrot.lane.b32.xlu0 %v669_v41, %s1124_s15 }
 0xd86   :  { %v622_v42 = vpop.permute.xlu2 %621 }
 0xd87   :  { %v624_v43 = vmul.f32 %v622_v42, %v607_v18 }
 0xd89   :  { %675 = vrot.lane.b32.xlu1 %v624_v43, %s1123_s3 }
 0xdf1   :  { %v672_v8 = vpop.permute.xlu0 %671 }
 0xdf2   :  { %988 = vmatmul.msk.f32.vlgmr.msra.gmra.mxu2 %vm122_vm2, %v672_v8 }
 0xdfb   :  { %v676_v44 = vpop.permute.xlu1 %675 }
 0xdfc   :  { %v678_v45 = vsel %vm122_vm2, %v672_v8, %v676_v44 }
 0xdfd   :  { %987 = vmatmul.msk.f32.vlgmr.msrb.gmra.mxu0 %vm184_vm6, %v678_v45 }
 0xe75   :  { %v743_v30 = vpop.f32.mrf.mxu2 }
 0xe76   :  { %v746_v31 = vadd.f32 %v743_v30, %v723_v46 }
 0xe78   :  { %v747_v32 = vmul.f32 %v746_v31, %v1237_v14 }
 0xe7a   :  { %1047 = vtanh.f32 %v747_v32  ;;  %v699_v36 = vpop.f32.mrf.mxu0 }
 0xe7b   :  { %v700_v37 = vadd.f32 %v1330_v49, %v699_v36 }
 0xe7d   :  { %v702_v38 = vmul.f32 %v700_v37, %v1237_v14 }
 0xe7f   :  { %1049 = vtanh.f32 %v702_v38 }
 0xe80   :  { %v1048_v39 = vpop.eup %1047 }
 0xe81   :  { %v749_v40 = vmul.f32 %v1048_v39, %v1237_v14 }
 0xe83   :  { %v750_v47 = vadd.f32 %v749_v40, %v1240_v19 }
 0xe85   :  { %v1050_v48 = vpop.eup %1049  ;;  %753 = vrot.lane.b32.xlu0 %v750_v47, %s1123_s3  ;;  %v751_v56 = vmul.f32 %v750_v47, %v663_v26 }
 0xe86   :  { %v704_v50 = vmul.f32 %v1050_v48, %v1237_v14 }
 0xe88   :  { %v705_v51 = vadd.f32 %v704_v50, %v1240_v19 }
 0xe8a   :  { %708 = vrot.lane.b32.xlu2 %v705_v51, %s1123_s3  ;;  %v706_v59 = vmul.f32 %v705_v51, %v618_v33 }
 0xee4   :  { %v709_v52 = vpop.permute.xlu2 %708 }
 0xee5   :  { %v711_v53 = vmul.f32 %v709_v52, %v705_v51 }
 0xee7   :  { %713 = vrot.lane.b32.xlu1 %v711_v53, %s1124_s15 }
 0xef7   :  { %v754_v54 = vpop.permute.xlu0 %753 }
 0xef8   :  { %v756_v55 = vmul.f32 %v754_v54, %v750_v47  ;;  %v919_v54 = vld [vmem:[%s1537_s8] sm:$0xff] }
 0xefa   :  { %758 = vrot.lane.b32.xlu2 %v756_v55, %s1124_s15 }
 0xf54   :  { %v759_v57 = vpop.permute.xlu2 %758 }
 0xf55   :  { %v761_v58 = vadd.f32 %v759_v57, %v751_v56 }
 0xf57   :  { %1051 = vtanh.f32 %v761_v58 }
 0xf59   :  { %v714_v60 = vpop.permute.xlu1 %713 }
 0xf5a   :  { %v716_v61 = vadd.f32 %v714_v60, %v706_v59 }
 0xf5c   :  { %1053 = vtanh.f32 %v716_v61 }
 0xf5d   :  { %v1052_v62 = vpop.eup %1051 }
 0xf5e   :  { %764 = vrot.lane.b32.xlu1 %v1052_v62, %s1123_s3 }
 0xf62   :  { %v1054_v63 = vpop.eup %1053 }
 0xf63   :  { %719 = vrot.lane.b32.xlu0 %v1054_v63, %s1123_s3 }
 0xfd0   :  { %v765_v0 = vpop.permute.xlu1 %764 }
 0xfd1   :  { %v767_v2 = vmul.f32 %v765_v0, %v750_v47 }
 0xfd3   :  { %769 = vrot.lane.b32.xlu2 %v767_v2, %s1124_s15 }
 0xfd5   :  { %v720_v3 = vpop.permute.xlu0 %719 }
 0xfd6   :  { %v722_v1 = vmul.f32 %v720_v3, %v705_v51 }
 0xfd8   :  { %773 = vrot.lane.b32.xlu0 %v722_v1, %s1123_s3 }
0x102d   :  { %v770_v4 = vpop.permute.xlu2 %769 }
0x102e   :  { %990 = vmatmul.msk.f32.vlgmr.msra.gmra.mxu1 %vm122_vm2, %v770_v4 }
0x104a   :  { %v774_v6 = vpop.permute.xlu0 %773 }
0x104b   :  { %v776_v5 = vsel %vm122_vm2, %v770_v4, %v774_v6 }
0x104c   :  { %989 = vmatmul.msk.f32.vlgmr.msrb.gmra.mxu3 %vm184_vm6, %v776_v5 }
0x10ab   :  { %v841_v9 = vpop.f32.mrf.mxu1 }
0x10ac   :  { %v844_v10 = vadd.f32 %v841_v9, %v821_v7 }
0x10ae   :  { %v845_v11 = vmul.f32 %v844_v10, %v1237_v14 }
0x10b0   :  { %1055 = vtanh.f32 %v845_v11 }
0x10b6   :  { %v1056_v12 = vpop.eup %1055 }
0x10b7   :  { %v847_v13 = vmul.f32 %v1056_v12, %v1237_v14 }
0x10b9   :  { %v848_v15 = vadd.f32 %v847_v13, %v1240_v19 }
0x10bb   :  { %851 = vrot.lane.b32.xlu2 %v848_v15, %s1123_s3  ;;  %v849_v27 = vmul.f32 %v848_v15, %v761_v58  ;;  %v1002_v58 = vld [vmem:[%s1538_s9] ss:$0 sm:$0xff] }
0x10cf   :  { %v797_v16 = vpop.f32.mrf.mxu3 }
0x10d0   :  { %v798_v17 = vadd.f32 %v1330_v49, %v797_v16 }
0x10d2   :  { %v800_v18 = vmul.f32 %v798_v17, %v1237_v14 }
0x10d4   :  { %1057 = vtanh.f32 %v800_v18 }
0x10da   :  { %v1058_v20 = vpop.eup %1057 }
0x10db   :  { %v802_v21 = vmul.f32 %v1058_v20, %v1237_v14 }
0x10dd   :  { %v803_v22 = vadd.f32 %v802_v21, %v1240_v19 }
0x10df   :  { %806 = vrot.lane.b32.xlu1 %v803_v22, %s1123_s3  ;;  %v804_v34 = vmul.f32 %v803_v22, %v716_v61 }
0x1115   :  { %v852_v23 = vpop.permute.xlu2 %851 }
0x1116   :  { %v854_v24 = vmul.f32 %v852_v23, %v848_v15 }
0x1118   :  { %856 = vrot.lane.b32.xlu1 %v854_v24, %s1124_s15 }
0x1151   :  { %v807_v25 = vpop.permute.xlu1 %806 }
0x1152   :  { %v809_v26 = vmul.f32 %v807_v25, %v803_v22 }
0x1154   :  { %811 = vrot.lane.b32.xlu0 %v809_v26, %s1124_s15 }
0x118a   :  { %v857_v28 = vpop.permute.xlu1 %856 }
0x118b   :  { %v859_v29 = vadd.f32 %v857_v28, %v849_v27 }
0x118d   :  { %1059 = vtanh.f32 %v859_v29 }
0x1193   :  { %v1060_v33 = vpop.eup %1059 }
0x1194   :  { %862 = vrot.lane.b32.xlu0 %v1060_v33, %s1123_s3 }
0x11c6   :  { %v812_v35 = vpop.permute.xlu0 %811 }
0x11c7   :  { %v814_v41 = vadd.f32 %v812_v35, %v804_v34 }
0x11c9   :  { %1061 = vtanh.f32 %v814_v41 }
0x11cf   :  { %v1062_v42 = vpop.eup %1061 }
0x11d0   :  { %817 = vrot.lane.b32.xlu2 %v1062_v42, %s1123_s3 }
0x1206   :  { %v863_v43 = vpop.permute.xlu0 %862 }
0x1207   :  { %v865_v8 = vmul.f32 %v863_v43, %v848_v15 }
0x1209   :  { %867 = vrot.lane.b32.xlu1 %v865_v8, %s1124_s15 }
0x122a   :  { %v818_v44 = vpop.permute.xlu2 %817 }
0x122b   :  { %v820_v45 = vmul.f32 %v818_v44, %v803_v22 }
0x122d   :  { %871 = vrot.lane.b32.xlu2 %v820_v45, %s1123_s3 }
0x127b   :  { %v868_v46 = vpop.permute.xlu1 %867 }
0x1287   :  { %v872_v30 = vpop.permute.xlu2 %871 }
0x1288   :  { %v874_v31 = vsel %vm122_vm2, %v868_v46, %v872_v30 }
0x1289   :  { %991 = vmatmul.msk.f32.vlgmr.msrb.gmra.mxu2 %vm184_vm6, %v874_v31 }
0x130c   :  { %v895_v32 = vpop.f32.mrf.mxu2 }
0x130d   :  { %v896_v36 = vadd.f32 %v1330_v49, %v895_v32  ;;  %v922_v49 = vld [vmem:[%s1537_s8 + $0x18] sm:$0xff] }
0x130e   :  { %944 = vmatpush.msra.mxu0 %v922_v49 }
0x130f   :  { %v898_v37 = vmul.f32 %v896_v36, %v1237_v14 }
0x1311   :  { %1063 = vtanh.f32 %v898_v37 }
0x1317   :  { %v1064_v38 = vpop.eup %1063 }
0x1318   :  { %v900_v39 = vmul.f32 %v1064_v38, %v1237_v14  ;;  %v921_v14 = vld [vmem:[%s1537_s8 + $0x10] sm:$0xff] }
0x1319   :  { %945 = vmatpush.msra.mxu0 %v921_v14 }
0x131a   :  { %v901_v40 = vadd.f32 %v900_v39, %v1240_v19  ;;  %v920_v19 = vld [vmem:[%s1537_s8 + $0x8] sm:$0xff] }
0x131b   :  { %946 = vmatpush.msra.mxu0 %v920_v19 }
0x131c   :  { %904 = vrot.lane.b32.xlu0 %v901_v40, %s1123_s3  ;;  %v902_v50 = vmul.f32 %v901_v40, %v814_v41 }
0x131d   :  { %947 = vmatpush.msra.mxu0 %v919_v54 }
0x138e   :  { %v905_v47 = vpop.permute.xlu0 %904 }
0x138f   :  { %v907_v48 = vmul.f32 %v905_v47, %v901_v40 }
0x1391   :  { %909 = vrot.lane.b32.xlu1 %v907_v48, %s1124_s15 }
0x1403   :  { %v910_v51 = vpop.permute.xlu1 %909 }
0x1404   :  { %v912_v52 = vadd.f32 %v910_v51, %v902_v50 }
0x1406   :  { %1065 = vtanh.f32 %v912_v52 }
0x140c   :  { %v1066_v53 = vpop.eup %1065 }
0x140d   :  { %915 = vrot.lane.b32.xlu2 %v1066_v53, %s1123_s3 }
0x1467   :  { %v916_v55 = vpop.permute.xlu2 %915 }
0x1468   :  { %v918_v56 = vmul.f32 %v916_v55, %v901_v40 }
0x146a   :  { %928 = vrot.lane.b32.xlu0 %v918_v56, %s1124_s15 }
0x14dc   :  { %v929_v57 = vpop.permute.xlu0 %928 }
0x14dd   :  { %992 = vmatmul.msk.f32.vlgmr.msra.gmra.mxu0 %vm122_vm2, %v929_v57 }
0x155a   :  { %v949_v59 = vpop.f32.mrf.mxu0 }
0x155b   :  { %v950_v60 = vadd.f32 %v1002_v58, %v949_v59 }
0x155d   :  { %953 = vst.msk [vmem:[#allocation6] sm:$0x3] %vm952_vm7, %v950_v60 }
0x155e   :  { %964 = dma.vmem_to_hbm [thread:$0]  %s960_s29, 32, %s962_s2, [#allocation5]  }
0x155f   :  { %1117 = dma.done.wait [#allocation5], 32  }
0x1560   :  { %1118 = vsyncadd [#allocation5], 4294967264 }
0x1561   :  { %969 = vsyncpa [#allocation4], 1 }
0x1562   :  { %970 = vsyncpa [#allocation5], 1 }

</bundles_post_ra>
